<compile_context>
chip_gen: v7x
topology: tpu7x:2x2x1
jax: 0.10.0
libtpu: 0.0.40
codegen_flags: <defaults>
</compile_context>

<pallas_src>
import numpy as np
import jax
import jax.numpy as jnp
from jax import lax
from jax.experimental import pallas as pl
from jax.experimental.pallas import tpu as pltpu


def _num_tensorcores_per_chip():
    """Best-effort: v7x-class chips have 2 TensorCores; v5e/v6e have 1."""
    try:
        kind = jax.devices()[0].device_kind.lower()
    except Exception:
        return 1
    return 2 if ("v7" in kind or "7x" in kind) else 1


def _pick_block_batch(N, H, W, C, Cout, compute_dtype, max_images=8,
                      vmem_budget_bytes=24 << 20):
    """Images per grid step: largest divisor of N whose double-buffered
    in/out blocks fit the VMEM budget.  The '>= 2 grid steps' constraint (so
    the 'parallel' batch axis can shard across TensorCores) is only applied on
    2-TC chips, and only when it costs at most a 2x reduction in B."""
    isz = np.dtype(compute_dtype).itemsize

    def step_bytes(b):
        # double-buffered padded-input block + f32 output block
        return 2 * (b * (H + 2) * (W + 2) * C * isz + b * H * W * Cout * 4)

    cands = [b for b in range(1, min(N, max_images) + 1)
             if N % b == 0 and step_bytes(b) <= vmem_budget_bytes]
    if not cands:
        cands = [1]
    best = max(cands)
    if _num_tensorcores_per_chip() >= 2:
        multi = [b for b in cands if N // b >= 2]
        if multi and 2 * max(multi) >= best:
            best = max(multi)
    # TODO(synk): for large H*W, add an H-tile grid axis with a 1-row halo so
    # per-step blocks stay inside v7x's 64 MiB VMEM.
    return best


def _make_kernel(B, H, W, C, Cout, compute_dtype):
    taps = [(dy, dx) for dy in range(3) for dx in range(3)]   # k = dy*3 + dx

    def kernel(x_ref, wd_ref, wp_ref, o_ref):
        # x_ref : (B, H+2, W+2, C)  pre-padded input, compute_dtype
        # wd_ref: (9, C)            depthwise weights, f32 (per-lane constants)
        # wp_ref: (C, Cout)         pointwise weights, compute_dtype
        wp = wp_ref[...]
        for b in range(B):                      # static unroll: chunks the matmul M dim
            # ---- depthwise 3x3: 9 broadcast VPU MACs over shifted windows ----
            acc = jnp.zeros((H, W, C), jnp.float32)
            for k, (dy, dx) in enumerate(taps):
                win = x_ref[b, dy:dy + H, dx:dx + W, :]            # (H, W, C)
                w_tap = wd_ref[k:k + 1, :].reshape(1, 1, C)        # per-lane constant
                acc = acc + win.astype(jnp.float32) * w_tap
            # ---- pointwise 1x1: ONE MXU matmul (H*W, C) x (C, Cout) ----
            y = jnp.dot(acc.reshape(H * W, C).astype(compute_dtype), wp,
                        preferred_element_type=jnp.float32)        # (H*W, Cout)
            o_ref[b, :, :, :] = y.reshape(H, W, Cout).astype(o_ref.dtype)

    return kernel


def depthwise_separable_conv(x_nchw, w_depthwise, w_pointwise, stride=1,
                             compute_dtype=jnp.float32):
    """Forward of DepthwiseSeparableConv.

    x_nchw:      (N, C, H, W)      PyTorch layout
    w_depthwise: (C, 1, 3, 3)      nn.Conv2d(C, C, 3, padding=1, groups=C, bias=False)
    w_pointwise: (Cout, C, 1, 1)   nn.Conv2d(C, Cout, 1, bias=False)
    returns:     (N, Cout, H, W)
    """
    # TODO(synk): stride > 1 not implemented (module default is stride=1); it
    # would only change the window gather to a strided one.
    assert stride == 1, "only stride=1 implemented"
    N, C, H, W = x_nchw.shape
    Cout = w_pointwise.shape[0]
    assert w_depthwise.shape == (C, 1, 3, 3)
    assert w_pointwise.shape == (Cout, C, 1, 1)

    # ---- one-off XLA glue: NCHW->NHWC, zero-pad halo, weight reshuffle ----
    x_nhwc = jnp.transpose(x_nchw, (0, 2, 3, 1)).astype(compute_dtype)     # (N,H,W,C)
    x_pad = jnp.pad(x_nhwc, ((0, 0), (1, 1), (1, 1), (0, 0)))              # (N,H+2,W+2,C)
    wd9 = jnp.transpose(w_depthwise[:, 0, :, :], (1, 2, 0)).reshape(9, C)  # [k, c]
    wd9 = wd9.astype(jnp.float32)            # tiny; keep f32 for the VPU MAC
    wp = jnp.transpose(w_pointwise[:, :, 0, 0], (1, 0)).astype(compute_dtype)  # [c, o]

    B = _pick_block_batch(N, H, W, C, Cout, compute_dtype)
    assert N % B == 0
    kernel = _make_kernel(B, H, W, C, Cout, compute_dtype)

    y_nhwc = pl.pallas_call(
        kernel,
        out_shape=jax.ShapeDtypeStruct((N, H, W, Cout), jnp.float32),
        grid_spec=pltpu.PrefetchScalarGridSpec(
            num_scalar_prefetch=0,
            grid=(N // B,),
            in_specs=[
                pl.BlockSpec((B, H + 2, W + 2, C), lambda n: (n, 0, 0, 0)),  # x chunk
                pl.BlockSpec((9, C), lambda n: (0, 0)),                      # dw weights
                pl.BlockSpec((C, Cout), lambda n: (0, 0)),                   # pw weights
            ],
            out_specs=pl.BlockSpec((B, H, W, Cout), lambda n: (n, 0, 0, 0)),
        ),
        compiler_params=pltpu.CompilerParams(
            dimension_semantics=("parallel",)),
    )(x_pad, wd9, wp)

    return jnp.transpose(y_nhwc, (0, 3, 1, 2))                   # back to NCHW


def ref_forward(x_nchw, w_depthwise, w_pointwise, stride=1):
    # Pure-JAX / XLA reference in PyTorch layout, used to validate the kernel.
    C = x_nchw.shape[1]
    dw = lax.conv_general_dilated(
        x_nchw, w_depthwise, window_strides=(stride, stride),
        padding=((1, 1), (1, 1)),
        dimension_numbers=("NCHW", "OIHW", "NCHW"),
        feature_group_count=C,
        precision=lax.Precision.HIGHEST)
    return lax.conv_general_dilated(
        dw, w_pointwise, window_strides=(1, 1), padding="VALID",
        dimension_numbers=("NCHW", "OIHW", "NCHW"),
        precision=lax.Precision.HIGHEST)


if __name__ == "__main__":
    # Small but TPU-lane-friendly sizes: C_out = 128 makes the output store
    # lane-dense; the whole problem stays tiny (x is 0.5 MB).
    N, C_in, C_out, H, W = 2, 64, 128, 16, 16

    key = jax.random.PRNGKey(0)
    kx, kd, kp = jax.random.split(key, 3)
    x = jax.random.normal(kx, (N, C_in, H, W), jnp.float32)
    # PyTorch-layout weights, kaiming-style scale (bias=False in both convs).
    w_dw = (jax.random.normal(kd, (C_in, 1, 3, 3), jnp.float32)
            * np.sqrt(2.0 / 9.0)).astype(jnp.float32)
    w_pw = (jax.random.normal(kp, (C_out, C_in, 1, 1), jnp.float32)
            * np.sqrt(2.0 / C_in)).astype(jnp.float32)

    ref = ref_forward(x, w_dw, w_pw)

    # f32 path (tolerance covers MXU default-precision f32 matmul behavior).
    out = jax.block_until_ready(depthwise_separable_conv(x, w_dw, w_pw))
    np.testing.assert_allclose(np.asarray(out), np.asarray(ref),
                               rtol=2e-2, atol=2e-2)

    # bf16-operand path (v6e/v7x MXU-native, f32 accumulation): loose check.
    out_bf16 = jax.block_until_ready(
        depthwise_separable_conv(x, w_dw, w_pw, compute_dtype=jnp.bfloat16))
    np.testing.assert_allclose(np.asarray(out_bf16), np.asarray(ref),
                               rtol=8e-2, atol=8e-2)

    print("KERNEL_OK")
</pallas_src>

<mosaic_0001>
module attributes {stable_mosaic.version = 11 : i64} {
  func.func @kernel(%arg0: i32, %arg1: memref<2x18x18x64xf32, #tpu.memory_space<vmem>>, %arg2: memref<9x64xf32, #tpu.memory_space<vmem>>, %arg3: memref<64x128xf32, #tpu.memory_space<vmem>>, %arg4: memref<2x16x16x128xf32, #tpu.memory_space<vmem>>) attributes {dimension_semantics = [#tpu.dimension_semantics<parallel>], iteration_bounds = array<i64: 1>, scalar_prefetch = 0 : i64, scratch_operands = 0 : i64, tpu.core_type = #tpu.core_type<tc>, window_params = [{transform_indices = @transform_0, window_bounds = array<i64: 2, 18, 18, 64>}, {pipeline_mode = #tpu.pipeline_mode<synchronous>, transform_indices = @transform_1, window_bounds = array<i64: 9, 64>}, {pipeline_mode = #tpu.pipeline_mode<synchronous>, transform_indices = @transform_2, window_bounds = array<i64: 64, 128>}, {transform_indices = @transform_3, window_bounds = array<i64: 2, 16, 16, 128>}]} {
    %c0 = arith.constant 0 : index
    %c0_0 = arith.constant 0 : index
    %0 = vector.load %arg3[%c0, %c0_0] : memref<64x128xf32, #tpu.memory_space<vmem>>, vector<64x128xf32>
    %cst = arith.constant 0.000000e+00 : f32
    %1 = vector.broadcast %cst : f32 to vector<16x16x64xf32>
    %c0_1 = arith.constant 0 : index
    %c0_2 = arith.constant 0 : index
    %c0_3 = arith.constant 0 : index
    %c0_4 = arith.constant 0 : index
    %2 = vector.load %arg1[%c0_1, %c0_2, %c0_3, %c0_4] : memref<2x18x18x64xf32, #tpu.memory_space<vmem>>, vector<1x16x16x64xf32>
    %3 = vector.shape_cast %2 : vector<1x16x16x64xf32> to vector<16x16x64xf32>
    %c0_5 = arith.constant 0 : index
    %c0_6 = arith.constant 0 : index
    %4 = vector.load %arg2[%c0_5, %c0_6] : memref<9x64xf32, #tpu.memory_space<vmem>>, vector<1x64xf32>
    %5 = vector.shape_cast %4 : vector<1x64xf32> to vector<1x1x64xf32>
    %6 = vector.broadcast %5 : vector<1x1x64xf32> to vector<16x16x64xf32>
    %7 = arith.mulf %3, %6 : vector<16x16x64xf32>
    %8 = arith.addf %1, %7 : vector<16x16x64xf32>
    %c0_7 = arith.constant 0 : index
    %c0_8 = arith.constant 0 : index
    %c1 = arith.constant 1 : index
    %c0_9 = arith.constant 0 : index
    %9 = vector.load %arg1[%c0_7, %c0_8, %c1, %c0_9] : memref<2x18x18x64xf32, #tpu.memory_space<vmem>>, vector<1x16x16x64xf32>
    %10 = vector.shape_cast %9 : vector<1x16x16x64xf32> to vector<16x16x64xf32>
    %c1_10 = arith.constant 1 : index
    %c0_11 = arith.constant 0 : index
    %11 = vector.load %arg2[%c1_10, %c0_11] : memref<9x64xf32, #tpu.memory_space<vmem>>, vector<1x64xf32>
    %12 = vector.shape_cast %11 : vector<1x64xf32> to vector<1x1x64xf32>
    %13 = vector.broadcast %12 : vector<1x1x64xf32> to vector<16x16x64xf32>
    %14 = arith.mulf %10, %13 : vector<16x16x64xf32>
    %15 = arith.addf %8, %14 : vector<16x16x64xf32>
    %c0_12 = arith.constant 0 : index
    %c0_13 = arith.constant 0 : index
    %c2 = arith.constant 2 : index
    %c0_14 = arith.constant 0 : index
    %16 = vector.load %arg1[%c0_12, %c0_13, %c2, %c0_14] : memref<2x18x18x64xf32, #tpu.memory_space<vmem>>, vector<1x16x16x64xf32>
    %17 = vector.shape_cast %16 : vector<1x16x16x64xf32> to vector<16x16x64xf32>
    %c2_15 = arith.constant 2 : index
    %c0_16 = arith.constant 0 : index
    %18 = vector.load %arg2[%c2_15, %c0_16] : memref<9x64xf32, #tpu.memory_space<vmem>>, vector<1x64xf32>
    %19 = vector.shape_cast %18 : vector<1x64xf32> to vector<1x1x64xf32>
    %20 = vector.broadcast %19 : vector<1x1x64xf32> to vector<16x16x64xf32>
    %21 = arith.mulf %17, %20 : vector<16x16x64xf32>
    %22 = arith.addf %15, %21 : vector<16x16x64xf32>
    %c0_17 = arith.constant 0 : index
    %c1_18 = arith.constant 1 : index
    %c0_19 = arith.constant 0 : index
    %c0_20 = arith.constant 0 : index
    %23 = vector.load %arg1[%c0_17, %c1_18, %c0_19, %c0_20] : memref<2x18x18x64xf32, #tpu.memory_space<vmem>>, vector<1x16x16x64xf32>
    %24 = vector.shape_cast %23 : vector<1x16x16x64xf32> to vector<16x16x64xf32>
    %c3 = arith.constant 3 : index
    %c0_21 = arith.constant 0 : index
    %25 = vector.load %arg2[%c3, %c0_21] : memref<9x64xf32, #tpu.memory_space<vmem>>, vector<1x64xf32>
    %26 = vector.shape_cast %25 : vector<1x64xf32> to vector<1x1x64xf32>
    %27 = vector.broadcast %26 : vector<1x1x64xf32> to vector<16x16x64xf32>
    %28 = arith.mulf %24, %27 : vector<16x16x64xf32>
    %29 = arith.addf %22, %28 : vector<16x16x64xf32>
    %c0_22 = arith.constant 0 : index
    %c1_23 = arith.constant 1 : index
    %c1_24 = arith.constant 1 : index
    %c0_25 = arith.constant 0 : index
    %30 = vector.load %arg1[%c0_22, %c1_23, %c1_24, %c0_25] : memref<2x18x18x64xf32, #tpu.memory_space<vmem>>, vector<1x16x16x64xf32>
    %31 = vector.shape_cast %30 : vector<1x16x16x64xf32> to vector<16x16x64xf32>
    %c4 = arith.constant 4 : index
    %c0_26 = arith.constant 0 : index
    %32 = vector.load %arg2[%c4, %c0_26] : memref<9x64xf32, #tpu.memory_space<vmem>>, vector<1x64xf32>
    %33 = vector.shape_cast %32 : vector<1x64xf32> to vector<1x1x64xf32>
    %34 = vector.broadcast %33 : vector<1x1x64xf32> to vector<16x16x64xf32>
    %35 = arith.mulf %31, %34 : vector<16x16x64xf32>
    %36 = arith.addf %29, %35 : vector<16x16x64xf32>
    %c0_27 = arith.constant 0 : index
    %c1_28 = arith.constant 1 : index
    %c2_29 = arith.constant 2 : index
    %c0_30 = arith.constant 0 : index
    %37 = vector.load %arg1[%c0_27, %c1_28, %c2_29, %c0_30] : memref<2x18x18x64xf32, #tpu.memory_space<vmem>>, vector<1x16x16x64xf32>
    %38 = vector.shape_cast %37 : vector<1x16x16x64xf32> to vector<16x16x64xf32>
    %c5 = arith.constant 5 : index
    %c0_31 = arith.constant 0 : index
    %39 = vector.load %arg2[%c5, %c0_31] : memref<9x64xf32, #tpu.memory_space<vmem>>, vector<1x64xf32>
    %40 = vector.shape_cast %39 : vector<1x64xf32> to vector<1x1x64xf32>
    %41 = vector.broadcast %40 : vector<1x1x64xf32> to vector<16x16x64xf32>
    %42 = arith.mulf %38, %41 : vector<16x16x64xf32>
    %43 = arith.addf %36, %42 : vector<16x16x64xf32>
    %c0_32 = arith.constant 0 : index
    %c2_33 = arith.constant 2 : index
    %c0_34 = arith.constant 0 : index
    %c0_35 = arith.constant 0 : index
    %44 = vector.load %arg1[%c0_32, %c2_33, %c0_34, %c0_35] : memref<2x18x18x64xf32, #tpu.memory_space<vmem>>, vector<1x16x16x64xf32>
    %45 = vector.shape_cast %44 : vector<1x16x16x64xf32> to vector<16x16x64xf32>
    %c6 = arith.constant 6 : index
    %c0_36 = arith.constant 0 : index
    %46 = vector.load %arg2[%c6, %c0_36] : memref<9x64xf32, #tpu.memory_space<vmem>>, vector<1x64xf32>
    %47 = vector.shape_cast %46 : vector<1x64xf32> to vector<1x1x64xf32>
    %48 = vector.broadcast %47 : vector<1x1x64xf32> to vector<16x16x64xf32>
    %49 = arith.mulf %45, %48 : vector<16x16x64xf32>
    %50 = arith.addf %43, %49 : vector<16x16x64xf32>
    %c0_37 = arith.constant 0 : index
    %c2_38 = arith.constant 2 : index
    %c1_39 = arith.constant 1 : index
    %c0_40 = arith.constant 0 : index
    %51 = vector.load %arg1[%c0_37, %c2_38, %c1_39, %c0_40] : memref<2x18x18x64xf32, #tpu.memory_space<vmem>>, vector<1x16x16x64xf32>
    %52 = vector.shape_cast %51 : vector<1x16x16x64xf32> to vector<16x16x64xf32>
    %c7 = arith.constant 7 : index
    %c0_41 = arith.constant 0 : index
    %53 = vector.load %arg2[%c7, %c0_41] : memref<9x64xf32, #tpu.memory_space<vmem>>, vector<1x64xf32>
    %54 = vector.shape_cast %53 : vector<1x64xf32> to vector<1x1x64xf32>
    %55 = vector.broadcast %54 : vector<1x1x64xf32> to vector<16x16x64xf32>
    %56 = arith.mulf %52, %55 : vector<16x16x64xf32>
    %57 = arith.addf %50, %56 : vector<16x16x64xf32>
    %c0_42 = arith.constant 0 : index
    %c2_43 = arith.constant 2 : index
    %c2_44 = arith.constant 2 : index
    %c0_45 = arith.constant 0 : index
    %58 = vector.load %arg1[%c0_42, %c2_43, %c2_44, %c0_45] : memref<2x18x18x64xf32, #tpu.memory_space<vmem>>, vector<1x16x16x64xf32>
    %59 = vector.shape_cast %58 : vector<1x16x16x64xf32> to vector<16x16x64xf32>
    %c8 = arith.constant 8 : index
    %c0_46 = arith.constant 0 : index
    %60 = vector.load %arg2[%c8, %c0_46] : memref<9x64xf32, #tpu.memory_space<vmem>>, vector<1x64xf32>
    %61 = vector.shape_cast %60 : vector<1x64xf32> to vector<1x1x64xf32>
    %62 = vector.broadcast %61 : vector<1x1x64xf32> to vector<16x16x64xf32>
    %63 = arith.mulf %59, %62 : vector<16x16x64xf32>
    %64 = arith.addf %57, %63 : vector<16x16x64xf32>
    %65 = vector.shape_cast %64 : vector<16x16x64xf32> to vector<256x64xf32>
    %cst_47 = arith.constant dense<0.000000e+00> : vector<256x128xf32>
    %66 = tpu.matmul %65, %0, %cst_47 {dimension_numbers = #tpu.dot_dimension_numbers<[1], [0], [0], [1], [0, 0, 1, 1], [], []>} : vector<256x64xf32>, vector<64x128xf32>, vector<256x128xf32> -> vector<256x128xf32>
    %67 = vector.shape_cast %66 : vector<256x128xf32> to vector<16x16x128xf32>
    %c0_48 = arith.constant 0 : index
    %c0_49 = arith.constant 0 : index
    %c0_50 = arith.constant 0 : index
    %c0_51 = arith.constant 0 : index
    %68 = vector.load %arg4[%c0_48, %c0_49, %c0_50, %c0_51] : memref<2x16x16x128xf32, #tpu.memory_space<vmem>>, vector<1x16x16x128xf32>
    %69 = vector.shape_cast %68 : vector<1x16x16x128xf32> to vector<16x16x128xf32>
    %70 = vector.shape_cast %67 : vector<16x16x128xf32> to vector<1x16x16x128xf32>
    tpu.vector_store %arg4[%c0_48, %c0_49, %c0_50, %c0_51], %70 {strides = array<i32>} : memref<2x16x16x128xf32, #tpu.memory_space<vmem>>, vector<1x16x16x128xf32>,
    %cst_52 = arith.constant 0.000000e+00 : f32
    %71 = vector.broadcast %cst_52 : f32 to vector<16x16x64xf32>
    %c1_53 = arith.constant 1 : index
    %c0_54 = arith.constant 0 : index
    %c0_55 = arith.constant 0 : index
    %c0_56 = arith.constant 0 : index
    %72 = vector.load %arg1[%c1_53, %c0_54, %c0_55, %c0_56] : memref<2x18x18x64xf32, #tpu.memory_space<vmem>>, vector<1x16x16x64xf32>
    %73 = vector.shape_cast %72 : vector<1x16x16x64xf32> to vector<16x16x64xf32>
    %c0_57 = arith.constant 0 : index
    %c0_58 = arith.constant 0 : index
    %74 = vector.load %arg2[%c0_57, %c0_58] : memref<9x64xf32, #tpu.memory_space<vmem>>, vector<1x64xf32>
    %75 = vector.shape_cast %74 : vector<1x64xf32> to vector<1x1x64xf32>
    %76 = vector.broadcast %75 : vector<1x1x64xf32> to vector<16x16x64xf32>
    %77 = arith.mulf %73, %76 : vector<16x16x64xf32>
    %78 = arith.addf %71, %77 : vector<16x16x64xf32>
    %c1_59 = arith.constant 1 : index
    %c0_60 = arith.constant 0 : index
    %c1_61 = arith.constant 1 : index
    %c0_62 = arith.constant 0 : index
    %79 = vector.load %arg1[%c1_59, %c0_60, %c1_61, %c0_62] : memref<2x18x18x64xf32, #tpu.memory_space<vmem>>, vector<1x16x16x64xf32>
    %80 = vector.shape_cast %79 : vector<1x16x16x64xf32> to vector<16x16x64xf32>
    %c1_63 = arith.constant 1 : index
    %c0_64 = arith.constant 0 : index
    %81 = vector.load %arg2[%c1_63, %c0_64] : memref<9x64xf32, #tpu.memory_space<vmem>>, vector<1x64xf32>
    %82 = vector.shape_cast %81 : vector<1x64xf32> to vector<1x1x64xf32>
    %83 = vector.broadcast %82 : vector<1x1x64xf32> to vector<16x16x64xf32>
    %84 = arith.mulf %80, %83 : vector<16x16x64xf32>
    %85 = arith.addf %78, %84 : vector<16x16x64xf32>
    %c1_65 = arith.constant 1 : index
    %c0_66 = arith.constant 0 : index
    %c2_67 = arith.constant 2 : index
    %c0_68 = arith.constant 0 : index
    %86 = vector.load %arg1[%c1_65, %c0_66, %c2_67, %c0_68] : memref<2x18x18x64xf32, #tpu.memory_space<vmem>>, vector<1x16x16x64xf32>
    %87 = vector.shape_cast %86 : vector<1x16x16x64xf32> to vector<16x16x64xf32>
    %c2_69 = arith.constant 2 : index
    %c0_70 = arith.constant 0 : index
    %88 = vector.load %arg2[%c2_69, %c0_70] : memref<9x64xf32, #tpu.memory_space<vmem>>, vector<1x64xf32>
    %89 = vector.shape_cast %88 : vector<1x64xf32> to vector<1x1x64xf32>
    %90 = vector.broadcast %89 : vector<1x1x64xf32> to vector<16x16x64xf32>
    %91 = arith.mulf %87, %90 : vector<16x16x64xf32>
    %92 = arith.addf %85, %91 : vector<16x16x64xf32>
    %c1_71 = arith.constant 1 : index
    %c1_72 = arith.constant 1 : index
    %c0_73 = arith.constant 0 : index
    %c0_74 = arith.constant 0 : index
    %93 = vector.load %arg1[%c1_71, %c1_72, %c0_73, %c0_74] : memref<2x18x18x64xf32, #tpu.memory_space<vmem>>, vector<1x16x16x64xf32>
    %94 = vector.shape_cast %93 : vector<1x16x16x64xf32> to vector<16x16x64xf32>
    %c3_75 = arith.constant 3 : index
    %c0_76 = arith.constant 0 : index
    %95 = vector.load %arg2[%c3_75, %c0_76] : memref<9x64xf32, #tpu.memory_space<vmem>>, vector<1x64xf32>
    %96 = vector.shape_cast %95 : vector<1x64xf32> to vector<1x1x64xf32>
    %97 = vector.broadcast %96 : vector<1x1x64xf32> to vector<16x16x64xf32>
    %98 = arith.mulf %94, %97 : vector<16x16x64xf32>
    %99 = arith.addf %92, %98 : vector<16x16x64xf32>
    %c1_77 = arith.constant 1 : index
    %c1_78 = arith.constant 1 : index
    %c1_79 = arith.constant 1 : index
    %c0_80 = arith.constant 0 : index
    %100 = vector.load %arg1[%c1_77, %c1_78, %c1_79, %c0_80] : memref<2x18x18x64xf32, #tpu.memory_space<vmem>>, vector<1x16x16x64xf32>
    %101 = vector.shape_cast %100 : vector<1x16x16x64xf32> to vector<16x16x64xf32>
    %c4_81 = arith.constant 4 : index
    %c0_82 = arith.constant 0 : index
    %102 = vector.load %arg2[%c4_81, %c0_82] : memref<9x64xf32, #tpu.memory_space<vmem>>, vector<1x64xf32>
    %103 = vector.shape_cast %102 : vector<1x64xf32> to vector<1x1x64xf32>
    %104 = vector.broadcast %103 : vector<1x1x64xf32> to vector<16x16x64xf32>
    %105 = arith.mulf %101, %104 : vector<16x16x64xf32>
    %106 = arith.addf %99, %105 : vector<16x16x64xf32>
    %c1_83 = arith.constant 1 : index
    %c1_84 = arith.constant 1 : index
    %c2_85 = arith.constant 2 : index
    %c0_86 = arith.constant 0 : index
    %107 = vector.load %arg1[%c1_83, %c1_84, %c2_85, %c0_86] : memref<2x18x18x64xf32, #tpu.memory_space<vmem>>, vector<1x16x16x64xf32>
    %108 = vector.shape_cast %107 : vector<1x16x16x64xf32> to vector<16x16x64xf32>
    %c5_87 = arith.constant 5 : index
    %c0_88 = arith.constant 0 : index
    %109 = vector.load %arg2[%c5_87, %c0_88] : memref<9x64xf32, #tpu.memory_space<vmem>>, vector<1x64xf32>
    %110 = vector.shape_cast %109 : vector<1x64xf32> to vector<1x1x64xf32>
    %111 = vector.broadcast %110 : vector<1x1x64xf32> to vector<16x16x64xf32>
    %112 = arith.mulf %108, %111 : vector<16x16x64xf32>
    %113 = arith.addf %106, %112 : vector<16x16x64xf32>
    %c1_89 = arith.constant 1 : index
    %c2_90 = arith.constant 2 : index
    %c0_91 = arith.constant 0 : index
    %c0_92 = arith.constant 0 : index
    %114 = vector.load %arg1[%c1_89, %c2_90, %c0_91, %c0_92] : memref<2x18x18x64xf32, #tpu.memory_space<vmem>>, vector<1x16x16x64xf32>
    %115 = vector.shape_cast %114 : vector<1x16x16x64xf32> to vector<16x16x64xf32>
    %c6_93 = arith.constant 6 : index
    %c0_94 = arith.constant 0 : index
    %116 = vector.load %arg2[%c6_93, %c0_94] : memref<9x64xf32, #tpu.memory_space<vmem>>, vector<1x64xf32>
    %117 = vector.shape_cast %116 : vector<1x64xf32> to vector<1x1x64xf32>
    %118 = vector.broadcast %117 : vector<1x1x64xf32> to vector<16x16x64xf32>
    %119 = arith.mulf %115, %118 : vector<16x16x64xf32>
    %120 = arith.addf %113, %119 : vector<16x16x64xf32>
    %c1_95 = arith.constant 1 : index
    %c2_96 = arith.constant 2 : index
    %c1_97 = arith.constant 1 : index
    %c0_98 = arith.constant 0 : index
    %121 = vector.load %arg1[%c1_95, %c2_96, %c1_97, %c0_98] : memref<2x18x18x64xf32, #tpu.memory_space<vmem>>, vector<1x16x16x64xf32>
    %122 = vector.shape_cast %121 : vector<1x16x16x64xf32> to vector<16x16x64xf32>
    %c7_99 = arith.constant 7 : index
    %c0_100 = arith.constant 0 : index
    %123 = vector.load %arg2[%c7_99, %c0_100] : memref<9x64xf32, #tpu.memory_space<vmem>>, vector<1x64xf32>
    %124 = vector.shape_cast %123 : vector<1x64xf32> to vector<1x1x64xf32>
    %125 = vector.broadcast %124 : vector<1x1x64xf32> to vector<16x16x64xf32>
    %126 = arith.mulf %122, %125 : vector<16x16x64xf32>
    %127 = arith.addf %120, %126 : vector<16x16x64xf32>
    %c1_101 = arith.constant 1 : index
    %c2_102 = arith.constant 2 : index
    %c2_103 = arith.constant 2 : index
    %c0_104 = arith.constant 0 : index
    %128 = vector.load %arg1[%c1_101, %c2_102, %c2_103, %c0_104] : memref<2x18x18x64xf32, #tpu.memory_space<vmem>>, vector<1x16x16x64xf32>
    %129 = vector.shape_cast %128 : vector<1x16x16x64xf32> to vector<16x16x64xf32>
    %c8_105 = arith.constant 8 : index
    %c0_106 = arith.constant 0 : index
    %130 = vector.load %arg2[%c8_105, %c0_106] : memref<9x64xf32, #tpu.memory_space<vmem>>, vector<1x64xf32>
    %131 = vector.shape_cast %130 : vector<1x64xf32> to vector<1x1x64xf32>
    %132 = vector.broadcast %131 : vector<1x1x64xf32> to vector<16x16x64xf32>
    %133 = arith.mulf %129, %132 : vector<16x16x64xf32>
    %134 = arith.addf %127, %133 : vector<16x16x64xf32>
    %135 = vector.shape_cast %134 : vector<16x16x64xf32> to vector<256x64xf32>
    %cst_107 = arith.constant dense<0.000000e+00> : vector<256x128xf32>
    %136 = tpu.matmul %135, %0, %cst_107 {dimension_numbers = #tpu.dot_dimension_numbers<[1], [0], [0], [1], [0, 0, 1, 1], [], []>} : vector<256x64xf32>, vector<64x128xf32>, vector<256x128xf32> -> vector<256x128xf32>
    %137 = vector.shape_cast %136 : vector<256x128xf32> to vector<16x16x128xf32>
    %c1_108 = arith.constant 1 : index
    %c0_109 = arith.constant 0 : index
    %c0_110 = arith.constant 0 : index
    %c0_111 = arith.constant 0 : index
    %138 = vector.load %arg4[%c1_108, %c0_109, %c0_110, %c0_111] : memref<2x16x16x128xf32, #tpu.memory_space<vmem>>, vector<1x16x16x128xf32>
    %139 = vector.shape_cast %138 : vector<1x16x16x128xf32> to vector<16x16x128xf32>
    %140 = vector.shape_cast %137 : vector<16x16x128xf32> to vector<1x16x16x128xf32>
    tpu.vector_store %arg4[%c1_108, %c0_109, %c0_110, %c0_111], %140 {strides = array<i32>} : memref<2x16x16x128xf32, #tpu.memory_space<vmem>>, vector<1x16x16x128xf32>,
    return
  }
  func.func @transform_0(%arg0: i32) -> (i32, i32, i32, i32) {
    %c0_i32 = arith.constant 0 : i32
    %c0_i32_0 = arith.constant 0 : i32
    %c0_i32_1 = arith.constant 0 : i32
    %c0_i32_2 = arith.constant 0 : i32
    return %arg0, %c0_i32, %c0_i32_0, %c0_i32_1 : i32, i32, i32, i32
  }
  func.func @transform_1(%arg0: i32) -> (i32, i32) {
    %c0_i32 = arith.constant 0 : i32
    %c0_i32_0 = arith.constant 0 : i32
    %c0_i32_1 = arith.constant 0 : i32
    return %c0_i32, %c0_i32_0 : i32, i32
  }
  func.func @transform_2(%arg0: i32) -> (i32, i32) {
    %c0_i32 = arith.constant 0 : i32
    %c0_i32_0 = arith.constant 0 : i32
    %c0_i32_1 = arith.constant 0 : i32
    return %c0_i32, %c0_i32_0 : i32, i32
  }
  func.func @transform_3(%arg0: i32) -> (i32, i32, i32, i32) {
    %c0_i32 = arith.constant 0 : i32
    %c0_i32_0 = arith.constant 0 : i32
    %c0_i32_1 = arith.constant 0 : i32
    %c0_i32_2 = arith.constant 0 : i32
    return %arg0, %c0_i32, %c0_i32_0, %c0_i32_1 : i32, i32, i32, i32
  }
}

</mosaic_0001>

<bundles_post_ra>
// kernel: tpu_custom_call.1
= control target key start
LH: loop header
LB: loop body
LE: loop exit
PB: predicated region body
PF: predicated region fallthrough
CT: control target
= control target key end

     0   :  { %vm934_vm0 = vcmask 523264   ;;  %s5826_s0 = inlined_call_operand.vmem [shape: f32[2,18,18,64], index: 0, kind: input, shape index: {}]   ;;  %s5827_s1 = inlined_call_operand.vmem [shape: f32[9,64], index: 1, kind: input, shape index: {}]   ;;  %s5828_s2 = inlined_call_operand.vmem [shape: f32[64,128], index: 2, kind: input, shape index: {}]   ;;  %s5829_s3 = inlined_call_operand.hbm [shape: f32[2,16,16,128], index: 3, kind: output, shape index: {}]  }
   0x1   :  { %v15_v0 = vld [vmem:[%s5828_s2] sm:$0xff]  ;;  %v16_v1 = vld [vmem:[%s5828_s2 + $0x8] sm:$0xff]  ;;  %v17_v2 = vld [vmem:[%s5828_s2 + $0x10] sm:$0xff] }
   0x2   :  { %v3340_v3 = vpack.c.bf16 %v16_v1, %v15_v0  ;;  %v18_v4 = vld [vmem:[%s5828_s2 + $0x18] sm:$0xff]  ;;  %v19_v5 = vld [vmem:[%s5828_s2 + $0x20] sm:$0xff]  ;;  %v20_v6 = vld [vmem:[%s5828_s2 + $0x28] sm:$0xff] }
   0x3   :  { %v3344_v7 = vpack.c.bf16 %v18_v4, %v17_v2  ;;  %v21_v8 = vld [vmem:[%s5828_s2 + $0x30] sm:$0xff]  ;;  %v22_v9 = vld [vmem:[%s5828_s2 + $0x38] sm:$0xff]  ;;  %v23_v10 = vld [vmem:[%s5826_s0] sm:$0xff]  ;;  %v3348_v19 = vpack.c.bf16 %v20_v6, %v19_v5 }
   0x4   :  { %3341 = vmatprep.subr.bf16.mxu0 %v3340_v3  ;;  %3357 = vmatprep.subr.bf16.mxu1 %v3340_v3  ;;  %v3470_v11 = vld [vmem:[%s5827_s1] ss:$0 sm:$0xff]  ;;  %v124_v12 = vld [vmem:[%s5826_s0 + $0x1] sm:$0xff]  ;;  %v2573_v18 = vld [vmem:[%s5826_s0 + $0x18] sm:$0xff]  ;;  %v3352_v29 = vpack.c.bf16 %v22_v9, %v21_v8 }
   0x5   :  { %v3478_v13 = vld [vmem:[%s5827_s1 + $0x1] ss:$0 sm:$0xff]  ;;  %3343 = vmatpush3.bf16.msra.mxu0 %v3340_v3  ;;  %3359 = vmatpush3.bf16.msra.mxu1 %v3340_v3  ;;  %v60_v14 = vmul.f32 %v3470_v11, %v23_v10  ;;  %v225_v16 = vld [vmem:[%s5826_s0 + $0x2] sm:$0xff]  ;;  %v2606_v22 = vld [vmem:[%s5826_s0 + $0x19] sm:$0xff]  ;;  %v62_v31 = vmul.f32 %v2573_v18, %v3470_v11 }
   0x6   :  { %v161_v15 = vmul.f32 %v3478_v13, %v124_v12  ;;  %v3488_v17 = vld [vmem:[%s5827_s1 + $0x2] ss:$0 sm:$0xff]  ;;  %3345 = vmatprep.subr.bf16.mxu0 %v3344_v7  ;;  %3361 = vmatprep.subr.bf16.mxu1 %v3344_v7  ;;  %v3497_v21 = vld [vmem:[%s5827_s1 + $0x3] ss:$0 sm:$0xff]  ;;  %v3505_v23 = vld [vmem:[%s5827_s1 + $0x4] ss:$0 sm:$0xff]  ;;  %v163_v32 = vmul.f32 %v2606_v22, %v3478_v13 }
   0x7   :  { %v262_v20 = vmul.f32 %v3488_v17, %v225_v16  ;;  %v364_v25 = vmul.f32 %v3497_v21, %v2573_v18  ;;  %v2639_v26 = vld [vmem:[%s5826_s0 + $0x1a] sm:$0xff]  ;;  %v3514_v27 = vld [vmem:[%s5827_s1 + $0x5] ss:$0 sm:$0xff]  ;;  %v3519_v28 = vld [vmem:[%s5826_s0 + $0x30] sm:$0xff]  ;;  %v465_v34 = vmul.f32 %v3505_v23, %v2606_v22 }
   0x8   :  { %v193_v24 = vadd.f32 %v161_v15, %v60_v14  ;;  %v3524_v30 = vld [vmem:[%s5827_s1 + $0x6] ss:$0 sm:$0xff]  ;;  %v566_v35 = vmul.f32 %v3514_v27, %v2639_v26  ;;  %v3533_v36 = vld [vmem:[%s5827_s1 + $0x7] ss:$0 sm:$0xff]  ;;  %v3538_v37 = vld [vmem:[%s5827_s1 + $0x8] ss:$0 sm:$0xff]  ;;  %v264_v43 = vmul.f32 %v2639_v26, %v3488_v17  ;;  %v3558_v44 = vmul.f32 %v3519_v28, %v3497_v21 }
   0x9   :  { %3347 = vmatpush3.bf16.msra.mxu0 %v3344_v7  ;;  %3363 = vmatpush3.bf16.msra.mxu1 %v3344_v7  ;;  %v2803_v38 = vld [vmem:[%s5826_s0 + $0x1b0] sm:$0xff]  ;;  %v3553_v42 = vld [vmem:[%s5826_s0 + $0x1c8] sm:$0xff]  ;;  %v668_v46 = vmul.f32 %v3524_v30, %v3519_v28  ;;  %v195_v57 = vadd.f32 %v163_v32, %v62_v31  ;;  %v3604_v63 = vld [vmem:[%s5826_s0 + $0x20] sm:$0xff] }
   0xa   :  { %v294_v33 = vadd.f32 %v262_v20, %v193_v24  ;;  %3349 = vmatprep.subr.bf16.mxu0 %v3348_v19  ;;  %3365 = vmatprep.subr.bf16.mxu1 %v3348_v19  ;;  %v1326_v39 = vmul.f32 %v2803_v38, %v3470_v11  ;;  %v2836_v40 = vld [vmem:[%s5826_s0 + $0x1b1] sm:$0xff]  ;;  %v1630_v53 = vmul.f32 %v3553_v42, %v3497_v21  ;;  %v3583_v54 = vld [vmem:[%s5826_s0 + $0x1c9] sm:$0xff]  ;;  %v3611_v1 = vld [vmem:[%s5826_s0 + $0x1e0] sm:$0xff] }
   0xb   :  { %v2869_v41 = vld [vmem:[%s5826_s0 + $0x1b2] sm:$0xff]  ;;  %v1427_v49 = vmul.f32 %v2836_v40, %v3478_v13  ;;  %v3588_v55 = vld [vmem:[%s5826_s0 + $0x1ca] sm:$0xff]  ;;  %v1731_v60 = vmul.f32 %v3583_v54, %v3505_v23  ;;  %v1934_v6 = vmul.f32 %v3611_v1, %v3524_v30  ;;  %v3620_v7 = vld [vmem:[%s5826_s0 + $0x1e1] sm:$0xff]  ;;  %v365_v15 = vmul.f32 %v3497_v21, %v3604_v63 }
   0xc   :  { %v396_v45 = vadd.f32 %v364_v25, %v294_v33  ;;  %v3565_v47 = vld [vmem:[%s5826_s0 + $0x31] sm:$0xff]  ;;  %v1528_v50 = vmul.f32 %v2869_v41, %v3488_v17  ;;  %v24_v56 = vld [vmem:[%s5826_s0 + $0x8] sm:$0xff]  ;;  %v1832_v0 = vmul.f32 %v3588_v55, %v3514_v27  ;;  %v2035_v10 = vmul.f32 %v3620_v7, %v3533_v36  ;;  %v2837_v16 = vld [vmem:[%s5826_s0 + $0x1b9] sm:$0xff] }
   0xd   :  { %v3570_v48 = vld [vmem:[%s5826_s0 + $0x32] sm:$0xff]  ;;  %v769_v51 = vmul.f32 %v3533_v36, %v3565_v47  ;;  %3351 = vmatpush3.bf16.msra.mxu0 %v3348_v19  ;;  %3367 = vmatpush3.bf16.msra.mxu1 %v3348_v19  ;;  %v1459_v59 = vadd.f32 %v1427_v49, %v1326_v39  ;;  %v125_v61 = vld [vmem:[%s5826_s0 + $0x9] sm:$0xff]  ;;  %v61_v2 = vmul.f32 %v3470_v11, %v24_v56  ;;  %v2870_v18 = vld [vmem:[%s5826_s0 + $0x1ba] sm:$0xff] }
   0xe   :  { %v870_v52 = vmul.f32 %v3538_v37, %v3570_v48  ;;  %v497_v58 = vadd.f32 %v465_v34, %v396_v45  ;;  %v226_v62 = vld [vmem:[%s5826_s0 + $0xa] sm:$0xff]  ;;  %3353 = vmatprep.subr.bf16.mxu0 %v3352_v29  ;;  %3369 = vmatprep.subr.bf16.mxu1 %v3352_v29  ;;  %v162_v3 = vmul.f32 %v3478_v13, %v125_v61  ;;  %v2804_v9 = vld [vmem:[%s5826_s0 + $0x1b8] sm:$0xff]  ;;  %v3631_v12 = vld [vmem:[%s5826_s0 + $0x1e2] sm:$0xff] }
   0xf   :  { %v1560_v5 = vadd.f32 %v1528_v50, %v1459_v59  ;;  %v263_v8 = vmul.f32 %v3488_v17, %v226_v62  ;;  %v296_v19 = vadd.f32 %v264_v43, %v195_v57  ;;  %v2136_v24 = vmul.f32 %v3631_v12, %v3538_v37  ;;  %v3646_v25 = vld [vmem:[%s5826_s0 + $0x21] sm:$0xff]  ;;  %v3651_v26 = vld [vmem:[%s5826_s0 + $0x1d0] sm:$0xff]  ;;  %v3667_v40 = vld [vmem:[%s5826_s0 + $0x38] sm:$0xff] }
  0x10   :  { %v598_v4 = vadd.f32 %v566_v35, %v497_v58  ;;  %v194_v14 = vadd.f32 %v162_v3, %v61_v2  ;;  %v3658_v32 = vld [vmem:[%s5826_s0 + $0x22] sm:$0xff]  ;;  %v1327_v33 = vmul.f32 %v2804_v9, %v3470_v11  ;;  %v1428_v34 = vmul.f32 %v2837_v16, %v3478_v13  ;;  %v3680_v49 = vld [vmem:[%s5826_s0 + $0x3a] sm:$0xff]  ;;  %v3691_v59 = vld [vmem:[%s5826_s0 + $0x1d1] sm:$0xff] }
  0x11   :  { %3355 = vmatpush3.bf16.msra.mxu0 %v3352_v29  ;;  %3371 = vmatpush3.bf16.msra.mxu1 %v3352_v29  ;;  %v1662_v22 = vadd.f32 %v1630_v53, %v1560_v5  ;;  %v466_v29 = vmul.f32 %v3505_v23, %v3646_v25  ;;  %v567_v39 = vmul.f32 %v3514_v27, %v3658_v32 }
  0x12   :  { %v700_v20 = vadd.f32 %v668_v46, %v598_v4  ;;  %v295_v31 = vadd.f32 %v263_v8, %v194_v14  ;;  %v1529_v41 = vmul.f32 %v2870_v18, %v3488_v17  ;;  %v669_v45 = vmul.f32 %v3524_v30, %v3667_v40  ;;  %v3675_v46 = vld [vmem:[%s5826_s0 + $0x39] sm:$0xff]  ;;  %v3707_v4 = vld [vmem:[%s5826_s0 + $0x1e8] sm:$0xff] }
  0x13   :  { %v1763_v38 = vadd.f32 %v1731_v60, %v1662_v22  ;;  %v1460_v50 = vadd.f32 %v1428_v34, %v1327_v33  ;;  %v770_v57 = vmul.f32 %v3533_v36, %v3675_v46  ;;  %v871_v58 = vmul.f32 %v3538_v37, %v3680_v49 }
  0x14   :  { %v801_v35 = vadd.f32 %v769_v51, %v700_v20  ;;  %v397_v43 = vadd.f32 %v365_v15, %v295_v31  ;;  %v1631_v51 = vmul.f32 %v3651_v26, %v3497_v21  ;;  %v1732_v62 = vmul.f32 %v3691_v59, %v3505_v23 }
  0x15   :  { %v1864_v56 = vadd.f32 %v1832_v0, %v1763_v38  ;;  %v1561_v61 = vadd.f32 %v1529_v41, %v1460_v50  ;;  %v398_v0 = vadd.f32 %v3558_v44, %v296_v19  ;;  %v467_v5 = vmul.f32 %v3565_v47, %v3505_v23  ;;  %v3716_v44 = vld [vmem:[%s5826_s0 + $0x48] sm:$0xff] }
  0x16   :  { %v902_v53 = vadd.f32 %v870_v52, %v801_v35  ;;  %v498_v60 = vadd.f32 %v466_v29, %v397_v43  ;;  %v3698_v52 = vld [vmem:[%s5826_s0 + $0x1d2] sm:$0xff]  ;;  %v568_v8 = vmul.f32 %v3570_v48, %v3514_v27  ;;  %v1935_v14 = vmul.f32 %v3707_v4, %v3524_v30  ;;  %v3725_v19 = vld [vmem:[%s5826_s0 + $0x49] sm:$0xff] }
  0x17   :  { %v1966_v2 = vadd.f32 %v1934_v6, %v1864_v56  ;;  %v1833_v3 = vmul.f32 %v3698_v52, %v3514_v27  ;;  %v1663_v9 = vadd.f32 %v1631_v51, %v1561_v61  ;;  %v670_v15 = vmul.f32 %v3524_v30, %v3716_v44  ;;  %v3738_v35 = vld [vmem:[%s5826_s0 + $0x1e9] sm:$0xff] }
  0x18   :  { %3228 = vmatprep.mubr.msk.f32.mxu0 %vm934_vm0, %v902_v53  ;;  %v599_v6 = vadd.f32 %v567_v39, %v498_v60  ;;  %v499_v18 = vadd.f32 %v467_v5, %v398_v0  ;;  %v1328_v20 = vmul.f32 %v3553_v42, %v3470_v11  ;;  %v1429_v22 = vmul.f32 %v3583_v54, %v3478_v13  ;;  %v3743_v42 = vld [vmem:[%s5826_s0 + $0x1ea] sm:$0xff] }
  0x19   :  { %v2067_v16 = vadd.f32 %v2035_v10, %v1966_v2  ;;  %v1764_v29 = vadd.f32 %v1732_v62, %v1663_v9  ;;  %v771_v33 = vmul.f32 %v3533_v36, %v3725_v19  ;;  %v1530_v10 = vmul.f32 %v3588_v55, %v3488_v17 }
  0x1a   :  { %v701_v31 = vadd.f32 %v669_v45, %v599_v6  ;;  %v600_v54 = vadd.f32 %v568_v8, %v499_v18  ;;  %v1461_v38 = vadd.f32 %v1429_v22, %v1328_v20  ;;  %v1632_v39 = vmul.f32 %v3611_v1, %v3497_v21  ;;  %v3754_v45 = vld [vmem:[%s5826_s0 + $0x4a] sm:$0xff] }
  0x1b   :  { %v2168_v34 = vadd.f32 %v2136_v24, %v2067_v16  ;;  %v1865_v43 = vadd.f32 %v1833_v3, %v1764_v29  ;;  %v2036_v55 = vmul.f32 %v3738_v35, %v3533_v36  ;;  %v2137_v24 = vmul.f32 %v3743_v42, %v3538_v37  ;;  %v3784_v16 = vld [vmem:[%s5826_s0 + $0x1f9] sm:$0xff] }
  0x1c   :  { %v802_v41 = vadd.f32 %v770_v57, %v701_v31  ;;  %v702_v50 = vadd.f32 %v670_v15, %v600_v54  ;;  %v872_v51 = vmul.f32 %v3538_v37, %v3754_v45  ;;  %v1562_v53 = vadd.f32 %v1530_v10, %v1461_v38 }
  0x1d   :  { %3292 = vmatprep.mubr.msk.f32.mxu1 %vm934_vm0, %v2168_v34  ;;  %v1733_v56 = vmul.f32 %v3620_v7, %v3505_v23  ;;  %v1967_v60 = vadd.f32 %v1935_v14, %v1865_v43  ;;  %v63_v61 = vmul.f32 %v3604_v63, %v3470_v11  ;;  %v164_v62 = vmul.f32 %v3646_v25, %v3478_v13  ;;  %v3824_v43 = vld [vmem:[%s5826_s0 + $0x52] sm:$0xff] }
  0x1e   :  { %v903_v57 = vadd.f32 %v871_v58, %v802_v41  ;;  %v803_v0 = vadd.f32 %v771_v33, %v702_v50  ;;  %v1664_v2 = vadd.f32 %v1632_v39, %v1562_v53  ;;  %v1834_v3 = vmul.f32 %v3631_v12, %v3514_v27  ;;  %v3773_v58 = vld [vmem:[%s5826_s0 + $0x1f8] sm:$0xff]  ;;  %v3801_v33 = vld [vmem:[%s5826_s0 + $0x50] sm:$0xff] }
  0x1f   :  { %v265_v5 = vmul.f32 %v3658_v32, %v3488_v17  ;;  %v2068_v8 = vadd.f32 %v2036_v55, %v1967_v60  ;;  %v196_v63 = vadd.f32 %v164_v62, %v63_v61  ;;  %v367_v25 = vmul.f32 %v3667_v40, %v3497_v21  ;;  %v3817_v41 = vld [vmem:[%s5826_s0 + $0x51] sm:$0xff] }
  0x20   :  { %3229 = vmatmul.mubr.msk.f32.vlgmr.msra.gmra.mrb[0].mxu0 %vm934_vm0, %v903_v57  ;;  %v904_v6 = vadd.f32 %v872_v51, %v803_v0  ;;  %v1765_v9 = vadd.f32 %v1733_v56, %v1664_v2  ;;  %v1936_v14 = vmul.f32 %v3773_v58, %v3524_v30  ;;  %v64_v32 = vmul.f32 %v3519_v28, %v3470_v11  ;;  %v3796_v28 = vld [vmem:[%s5826_s0 + $0x1fa] sm:$0xff] }
  0x21   :  { %v2169_v15 = vadd.f32 %v2137_v24, %v2068_v8  ;;  %v297_v18 = vadd.f32 %v265_v5, %v196_v63  ;;  %v468_v20 = vmul.f32 %v3675_v46, %v3505_v23  ;;  %v1329_v22 = vmul.f32 %v3651_v26, %v3470_v11  ;;  %v3841_v0 = vld [vmem:[%s5826_s0 + $0x200] sm:$0xff] }
  0x22   :  { %3231 = vmatprep.mubr.msk.f32.mxu0 %vm934_vm0, %v904_v6  ;;  %v1866_v31 = vadd.f32 %v1834_v3, %v1765_v9  ;;  %v2037_v29 = vmul.f32 %v3784_v16, %v3533_v36  ;;  %v1430_v10 = vmul.f32 %v3691_v59, %v3478_v13  ;;  %v1531_v26 = vmul.f32 %v3698_v52, %v3488_v17  ;;  %v3854_v9 = vld [vmem:[%s5826_s0 + $0x201] sm:$0xff] }
  0x23   :  { %3293 = vmatmul.mubr.msk.f32.vlgmr.msra.gmra.mrb[0].mxu1 %vm934_vm0, %v2169_v15  ;;  %v2138_v34 = vmul.f32 %v3796_v28, %v3538_v37  ;;  %v399_v54 = vadd.f32 %v367_v25, %v297_v18  ;;  %v569_v38 = vmul.f32 %v3680_v49, %v3514_v27  ;;  %v671_v39 = vmul.f32 %v3524_v30, %v3801_v33 }
  0x24   :  { %v1968_v59 = vadd.f32 %v1936_v14, %v1866_v31  ;;  %v772_v52 = vmul.f32 %v3533_v36, %v3817_v41  ;;  %v1462_v55 = vadd.f32 %v1430_v10, %v1329_v22  ;;  %v1633_v24 = vmul.f32 %v3707_v4, %v3497_v21  ;;  %v3859_v14 = vld [vmem:[%s5826_s0 + $0x202] sm:$0xff] }
  0x25   :  { %v500_v50 = vadd.f32 %v468_v20, %v399_v54  ;;  %v873_v51 = vmul.f32 %v3538_v37, %v3824_v43  ;;  %v165_v53 = vmul.f32 %v3565_v47, %v3478_v13  ;;  %v266_v56 = vmul.f32 %v3570_v48, %v3488_v17 }
  0x26   :  { %v2069_v57 = vadd.f32 %v2037_v29, %v1968_v59  ;;  %v1563_v60 = vadd.f32 %v1531_v26, %v1462_v55  ;;  %v1734_v61 = vmul.f32 %v3738_v35, %v3505_v23  ;;  %v1835_v62 = vmul.f32 %v3743_v42, %v3514_v27  ;;  %v3888_v55 = vld [vmem:[%s5826_s0 + $0x61] sm:$0xff] }
  0x27   :  { %v601_v2 = vadd.f32 %v569_v38, %v500_v50  ;;  %v1937_v47 = vmul.f32 %v3841_v0, %v3524_v30  ;;  %v197_v3 = vadd.f32 %v165_v53, %v64_v32  ;;  %v368_v48 = vmul.f32 %v3716_v44, %v3497_v21 }
  0x28   :  { %v2170_v5 = vadd.f32 %v2138_v34, %v2069_v57  ;;  %v1665_v8 = vadd.f32 %v1633_v24, %v1563_v60  ;;  %v469_v63 = vmul.f32 %v3725_v19, %v3505_v23  ;;  %v1330_v25 = vmul.f32 %v3611_v1, %v3470_v11  ;;  %v3902_v60 = vld [vmem:[%s5826_s0 + $0x62] sm:$0xff] }
  0x29   :  { %v703_v6 = vadd.f32 %v671_v39, %v601_v2  ;;  %v298_v32 = vadd.f32 %v266_v56, %v197_v3  ;;  %v1431_v15 = vmul.f32 %v3620_v7, %v3478_v13  ;;  %v1532_v18 = vmul.f32 %v3631_v12, %v3488_v17  ;;  %v3875_v7 = vld [vmem:[%s5826_s0 + $0x60] sm:$0xff] }
  0x2a   :  { %3295 = vmatprep.mubr.msk.f32.mxu1 %vm934_vm0, %v2170_v5  ;;  %v1766_v1 = vadd.f32 %v1734_v61, %v1665_v8  ;;  %v2038_v20 = vmul.f32 %v3854_v9, %v3533_v36  ;;  %v2139_v22 = vmul.f32 %v3859_v14, %v3538_v37  ;;  %v570_v31 = vmul.f32 %v3754_v45, %v3514_v27 }
  0x2b   :  { %v804_v29 = vadd.f32 %v772_v52, %v703_v6  ;;  %v400_v10 = vadd.f32 %v368_v48, %v298_v32  ;;  %v1463_v12 = vadd.f32 %v1431_v15, %v1330_v25  ;;  %v1634_v26 = vmul.f32 %v3773_v58, %v3497_v21 }
  0x2c   :  { %v1867_v34 = vadd.f32 %v1835_v62, %v1766_v1  ;;  %v672_v54 = vmul.f32 %v3524_v30, %v3875_v7  ;;  %v1735_v38 = vmul.f32 %v3784_v16, %v3505_v23  ;;  %v65_v39 = vmul.f32 %v3667_v40, %v3470_v11 }
  0x2d   :  { %v905_v59 = vadd.f32 %v873_v51, %v804_v29  ;;  %v501_v52 = vadd.f32 %v469_v63, %v400_v10  ;;  %v1564_v24 = vadd.f32 %v1532_v18, %v1463_v12  ;;  %v166_v50 = vmul.f32 %v3675_v46, %v3478_v13  ;;  %v3907_v46 = vld [vmem:[%s5826_s0 + $0x210] sm:$0xff] }
  0x2e   :  { %v1969_v53 = vadd.f32 %v1937_v47, %v1867_v34  ;;  %v773_v56 = vmul.f32 %v3533_v36, %v3888_v55  ;;  %v1836_v57 = vmul.f32 %v3796_v28, %v3514_v27  ;;  %v267_v40 = vmul.f32 %v3680_v49, %v3488_v17  ;;  %v3920_v63 = vld [vmem:[%s5826_s0 + $0x211] sm:$0xff] }
  0x2f   :  { %3232 = vmatmul.mubr.msk.f32.gmra.mrb[2].mxu0 %vm934_vm0, %v905_v59  ;;  %v602_v51 = vadd.f32 %v570_v31, %v501_v52  ;;  %v1666_v61 = vadd.f32 %v1634_v26, %v1564_v24  ;;  %v198_v62 = vadd.f32 %v166_v50, %v65_v39  ;;  %v369_v2 = vmul.f32 %v3801_v33, %v3497_v21  ;;  %v3933_v29 = vld [vmem:[%s5826_s0 + $0x212] sm:$0xff]  ;;  %v3954_v59 = vld [vmem:[%s5826_s0 + $0x69] sm:$0xff] }
  0x30   :  { %v2070_v47 = vadd.f32 %v2038_v20, %v1969_v53  ;;  %v874_v49 = vmul.f32 %v3538_v37, %v3902_v60  ;;  %v1938_v3 = vmul.f32 %v3907_v46, %v3524_v30  ;;  %v470_v48 = vmul.f32 %v3817_v41, %v3505_v23  ;;  %v3959_v52 = vld [vmem:[%s5826_s0 + $0x6a] sm:$0xff] }
  0x31   :  { %v704_v5 = vadd.f32 %v672_v54, %v602_v51  ;;  %v1767_v8 = vadd.f32 %v1735_v38, %v1666_v61  ;;  %v299_v25 = vadd.f32 %v267_v40, %v198_v62  ;;  %v1331_v6 = vmul.f32 %v3707_v4, %v3470_v11 }
  0x32   :  { %v2171_v32 = vadd.f32 %v2139_v22, %v2070_v47  ;;  %v2039_v15 = vmul.f32 %v3920_v63, %v3533_v36  ;;  %v1432_v18 = vmul.f32 %v3738_v35, %v3478_v13  ;;  %v1533_v1 = vmul.f32 %v3743_v42, %v3488_v17  ;;  %v3940_v22 = vld [vmem:[%s5826_s0 + $0x68] sm:$0xff] }
  0x33   :  { %v805_v20 = vadd.f32 %v773_v56, %v704_v5  ;;  %v1868_v31 = vadd.f32 %v1836_v57, %v1767_v8  ;;  %v401_v10 = vadd.f32 %v369_v2, %v299_v25  ;;  %v571_v4 = vmul.f32 %v3824_v43, %v3514_v27 }
  0x34   :  { %3296 = vmatmul.mubr.msk.f32.gmra.mrb[2].mxu1 %vm934_vm0, %v2171_v32  ;;  %v2140_v35 = vmul.f32 %v3933_v29, %v3538_v37  ;;  %v673_v42 = vmul.f32 %v3524_v30, %v3940_v22  ;;  %v1464_v12 = vadd.f32 %v1432_v18, %v1331_v6  ;;  %v1635_v26 = vmul.f32 %v3841_v0, %v3497_v21 }
  0x35   :  { %v906_v34 = vadd.f32 %v874_v49, %v805_v20  ;;  %v1970_v54 = vadd.f32 %v1938_v3, %v1868_v31  ;;  %v502_v38 = vadd.f32 %v470_v48, %v401_v10  ;;  %v1736_v39 = vmul.f32 %v3854_v9, %v3505_v23 }
  0x36   :  { %v1565_v24 = vadd.f32 %v1533_v1, %v1464_v12  ;;  %v66_v50 = vmul.f32 %v3716_v44, %v3470_v11  ;;  %v167_v53 = vmul.f32 %v3725_v19, %v3478_v13  ;;  %v268_v56 = vmul.f32 %v3754_v45, %v3488_v17 }
  0x37   :  { %8 = vsyncpa [#allocation3], 0  ;;  %3234 = vmatprep.mubr.msk.f32.mxu0 %vm934_vm0, %v906_v34  ;;  %v2071_v57 = vadd.f32 %v2039_v15, %v1970_v54  ;;  %v603_v40 = vadd.f32 %v571_v4, %v502_v38  ;;  %v774_v51 = vmul.f32 %v3533_v36, %v3954_v59  ;;  %v875_v61 = vmul.f32 %v3538_v37, %v3959_v52  ;;  %v3977_v19 = vld [vmem:[%s5826_s0 + $0x218] sm:$0xff] }
  0x38   :  { %v1667_v62 = vadd.f32 %v1635_v26, %v1565_v24  ;;  %v1837_v44 = vmul.f32 %v3859_v14, %v3514_v27  ;;  %v199_v45 = vadd.f32 %v167_v53, %v66_v50  ;;  %v370_v2 = vmul.f32 %v3875_v7, %v3497_v21  ;;  %v3988_v8 = vld [vmem:[%s5826_s0 + $0x219] sm:$0xff] }
  0x39   :  { %v2172_v47 = vadd.f32 %v2140_v35, %v2071_v57  ;;  %v705_v49 = vadd.f32 %v673_v42, %v603_v40  ;;  %v1939_v3 = vmul.f32 %v3977_v19, %v3524_v30  ;;  %v471_v48 = vmul.f32 %v3888_v55, %v3505_v23  ;;  %v4022_v38 = vld [vmem:[%s5826_s0 + $0x79] sm:$0xff] }
  0x3a   :  { %v1768_v5 = vadd.f32 %v1736_v39, %v1667_v62  ;;  %v300_v25 = vadd.f32 %v268_v56, %v199_v45  ;;  %v1332_v6 = vmul.f32 %v3773_v58, %v3470_v11  ;;  %v1433_v32 = vmul.f32 %v3784_v16, %v3478_v13  ;;  %v4004_v58 = vld [vmem:[%s5826_s0 + $0x21a] sm:$0xff]  ;;  %v4050_v45 = vld [vmem:[%s5826_s0 + $0x229] sm:$0xff] }
  0x3b   :  { %3298 = vmatprep.mubr.msk.f32.mxu1 %vm934_vm0, %v2172_v47  ;;  %v806_v15 = vadd.f32 %v774_v51, %v705_v49  ;;  %v2040_v18 = vmul.f32 %v3988_v8, %v3533_v36  ;;  %v572_v1 = vmul.f32 %v3902_v60, %v3514_v27  ;;  %v1534_v20 = vmul.f32 %v3796_v28, %v3488_v17  ;;  %v4009_v16 = vld [vmem:[%s5826_s0 + $0x78] sm:$0xff] }
  0x3c   :  { %v1869_v31 = vadd.f32 %v1837_v44, %v1768_v5  ;;  %v402_v10 = vadd.f32 %v370_v2, %v300_v25  ;;  %v1465_v4 = vadd.f32 %v1433_v32, %v1332_v6  ;;  %v1636_v35 = vmul.f32 %v3907_v46, %v3497_v21  ;;  %v4027_v39 = vld [vmem:[%s5826_s0 + $0x7a] sm:$0xff]  ;;  %v4045_v44 = vld [vmem:[%s5826_s0 + $0x228] sm:$0xff] }
  0x3d   :  { %v907_v42 = vadd.f32 %v875_v61, %v806_v15  ;;  %v2141_v28 = vmul.f32 %v4004_v58, %v3538_v37  ;;  %v674_v12 = vmul.f32 %v3524_v30, %v4009_v16  ;;  %v1737_v26 = vmul.f32 %v3920_v63, %v3505_v23  ;;  %v4063_v25 = vld [vmem:[%s5826_s0 + $0x22a] sm:$0xff] }
  0x3e   :  { %v1971_v34 = vadd.f32 %v1939_v3, %v1869_v31  ;;  %v503_v54 = vadd.f32 %v471_v48, %v402_v10  ;;  %v1566_v24 = vadd.f32 %v1534_v20, %v1465_v4  ;;  %v67_v50 = vmul.f32 %v3801_v33, %v3470_v11  ;;  %v4079_v10 = vld [vmem:[%s5826_s0 + $0x80] sm:$0xff] }
  0x3f   :  { %3235 = vmatmul.mubr.msk.f32.gmra.mrb[4].mxu0 %vm934_vm0, %v907_v42  ;;  %v775_v53 = vmul.f32 %v3533_v36, %v4022_v38  ;;  %v876_v56 = vmul.f32 %v3538_v37, %v4027_v39  ;;  %v168_v57 = vmul.f32 %v3817_v41, %v3478_v13  ;;  %v269_v40 = vmul.f32 %v3824_v43, %v3488_v17 }
  0x40   :  { %v2072_v51 = vadd.f32 %v2040_v18, %v1971_v34  ;;  %v604_v61 = vadd.f32 %v572_v1, %v503_v54  ;;  %v1668_v62 = vadd.f32 %v1636_v35, %v1566_v24  ;;  %v1838_v33 = vmul.f32 %v3933_v29, %v3514_v27  ;;  %v4092_v54 = vld [vmem:[%s5826_s0 + $0x81] sm:$0xff] }
  0x41   :  { %v1940_v41 = vmul.f32 %v4045_v44, %v3524_v30  ;;  %v2041_v43 = vmul.f32 %v4050_v45, %v3533_v36  ;;  %v200_v2 = vadd.f32 %v168_v57, %v67_v50  ;;  %v371_v47 = vmul.f32 %v3940_v22, %v3497_v21  ;;  %v4097_v24 = vld [vmem:[%s5826_s0 + $0x82] sm:$0xff] }
  0x42   :  { %v2173_v49 = vadd.f32 %v2141_v28, %v2072_v51  ;;  %v706_v3 = vadd.f32 %v674_v12, %v604_v61  ;;  %v1769_v48 = vadd.f32 %v1737_v26, %v1668_v62  ;;  %v1333_v5 = vmul.f32 %v3841_v0, %v3470_v11 }
  0x43   :  { %v301_v6 = vadd.f32 %v269_v40, %v200_v2  ;;  %v472_v32 = vmul.f32 %v3954_v59, %v3505_v23  ;;  %v1434_v15 = vmul.f32 %v3854_v9, %v3478_v13  ;;  %v1535_v18 = vmul.f32 %v3859_v14, %v3488_v17 }
  0x44   :  { %3299 = vmatmul.mubr.msk.f32.gmra.mrb[4].mxu1 %vm934_vm0, %v2173_v49  ;;  %v807_v1 = vadd.f32 %v775_v53, %v706_v3  ;;  %v1870_v20 = vadd.f32 %v1838_v33, %v1769_v48  ;;  %v2142_v0 = vmul.f32 %v4063_v25, %v3538_v37  ;;  %v573_v31 = vmul.f32 %v3959_v52, %v3514_v27  ;;  %v4126_v48 = vld [vmem:[%s5826_s0 + $0x231] sm:$0xff] }
  0x45   :  { %v403_v4 = vadd.f32 %v371_v47, %v301_v6  ;;  %v675_v9 = vmul.f32 %v3524_v30, %v4079_v10  ;;  %v1466_v14 = vadd.f32 %v1434_v15, %v1333_v5  ;;  %v1637_v35 = vmul.f32 %v3977_v19, %v3497_v21 }
  0x46   :  { %v908_v42 = vadd.f32 %v876_v56, %v807_v1  ;;  %v1972_v28 = vadd.f32 %v1940_v41, %v1870_v20  ;;  %v1738_v12 = vmul.f32 %v3988_v8, %v3505_v23  ;;  %v68_v26 = vmul.f32 %v3875_v7, %v3470_v11 }
  0x47   :  { %v504_v34 = vadd.f32 %v472_v32, %v403_v4  ;;  %v1567_v50 = vadd.f32 %v1535_v18, %v1466_v14  ;;  %v169_v53 = vmul.f32 %v3888_v55, %v3478_v13  ;;  %v270_v56 = vmul.f32 %v3902_v60, %v3488_v17  ;;  %v4113_v55 = vld [vmem:[%s5826_s0 + $0x230] sm:$0xff] }
  0x48   :  { %3237 = vmatprep.mubr.msk.f32.mxu0 %vm934_vm0, %v908_v42  ;;  %v2073_v7 = vadd.f32 %v2041_v43, %v1972_v28  ;;  %v776_v57 = vmul.f32 %v3533_v36, %v4092_v54  ;;  %v877_v40 = vmul.f32 %v3538_v37, %v4097_v24  ;;  %v1839_v51 = vmul.f32 %v4004_v58, %v3514_v27 }
  0x49   :  { %v605_v61 = vadd.f32 %v573_v31, %v504_v34  ;;  %v1669_v62 = vadd.f32 %v1637_v35, %v1567_v50  ;;  %v201_v60 = vadd.f32 %v169_v53, %v68_v26  ;;  %v372_v33 = vmul.f32 %v4009_v16, %v3497_v21  ;;  %v4147_v31 = vld [vmem:[%s5826_s0 + $0x90] sm:$0xff] }
  0x4a   :  { %v2174_v41 = vadd.f32 %v2142_v0, %v2073_v7  ;;  %v1941_v43 = vmul.f32 %v4113_v55, %v3524_v30  ;;  %v473_v2 = vmul.f32 %v4022_v38, %v3505_v23  ;;  %v1334_v47 = vmul.f32 %v3907_v46, %v3470_v11  ;;  %v4160_v26 = vld [vmem:[%s5826_s0 + $0x91] sm:$0xff] }
  0x4b   :  { %v707_v49 = vadd.f32 %v675_v9, %v605_v61  ;;  %v1770_v3 = vadd.f32 %v1738_v12, %v1669_v62  ;;  %v302_v5 = vadd.f32 %v270_v56, %v201_v60  ;;  %v1435_v6 = vmul.f32 %v3920_v63, %v3478_v13  ;;  %v4142_v63 = vld [vmem:[%s5826_s0 + $0x232] sm:$0xff]  ;;  %v4181_v62 = vld [vmem:[%s5826_s0 + $0x240] sm:$0xff] }
  0x4c   :  { %3301 = vmatprep.mubr.msk.f32.mxu1 %vm934_vm0, %v2174_v41  ;;  %v2042_v32 = vmul.f32 %v4126_v48, %v3533_v36  ;;  %v574_v15 = vmul.f32 %v4027_v39, %v3514_v27  ;;  %v1536_v46 = vmul.f32 %v3933_v29, %v3488_v17  ;;  %v1638_v18 = vmul.f32 %v4045_v44, %v3497_v21  ;;  %v4165_v34 = vld [vmem:[%s5826_s0 + $0x92] sm:$0xff] }
  0x4d   :  { %v808_v1 = vadd.f32 %v776_v57, %v707_v49  ;;  %v1871_v20 = vadd.f32 %v1839_v51, %v1770_v3  ;;  %v404_v0 = vadd.f32 %v372_v33, %v302_v5  ;;  %v1467_v4 = vadd.f32 %v1435_v6, %v1334_v47  ;;  %v4199_v3 = vld [vmem:[%s5826_s0 + $0x242] sm:$0xff] }
  0x4e   :  { %v2143_v29 = vmul.f32 %v4142_v63, %v3538_v37  ;;  %v676_v9 = vmul.f32 %v3524_v30, %v4147_v31  ;;  %v1739_v14 = vmul.f32 %v4050_v45, %v3505_v23  ;;  %v69_v35 = vmul.f32 %v3940_v22, %v3470_v11 }
  0x4f   :  { %v909_v42 = vadd.f32 %v877_v40, %v808_v1  ;;  %v1973_v28 = vadd.f32 %v1941_v43, %v1871_v20  ;;  %v505_v12 = vadd.f32 %v473_v2, %v404_v0  ;;  %v1568_v50 = vadd.f32 %v1536_v46, %v1467_v4  ;;  %v4215_v20 = vld [vmem:[%s5826_s0 + $0x98] sm:$0xff] }
  0x50   :  { %v777_v53 = vmul.f32 %v3533_v36, %v4160_v26  ;;  %v878_v22 = vmul.f32 %v3538_v37, %v4165_v34  ;;  %v170_v56 = vmul.f32 %v3954_v59, %v3478_v13  ;;  %v271_v7 = vmul.f32 %v3959_v52, %v3488_v17  ;;  %v4186_v59 = vld [vmem:[%s5826_s0 + $0x241] sm:$0xff] }
  0x51   :  { %3238 = vmatmul.mubr.msk.f32.gmra.mrb[6].mxu0 %vm934_vm0, %v909_v42  ;;  %v2074_v57 = vadd.f32 %v2042_v32, %v1973_v28  ;;  %v606_v40 = vadd.f32 %v574_v15, %v505_v12  ;;  %v1670_v51 = vadd.f32 %v1638_v18, %v1568_v50  ;;  %v1840_v61 = vmul.f32 %v4063_v25, %v3514_v27  ;;  %v4228_v28 = vld [vmem:[%s5826_s0 + $0x99] sm:$0xff] }
  0x52   :  { %v1942_v52 = vmul.f32 %v4181_v62, %v3524_v30  ;;  %v2043_v60 = vmul.f32 %v4186_v59, %v3533_v36  ;;  %v202_v33 = vadd.f32 %v170_v56, %v69_v35  ;;  %v373_v41 = vmul.f32 %v4079_v10, %v3497_v21  ;;  %v4233_v12 = vld [vmem:[%s5826_s0 + $0x9a] sm:$0xff] }
  0x53   :  { %v2175_v43 = vadd.f32 %v2143_v29, %v2074_v57  ;;  %v708_v2 = vadd.f32 %v676_v9, %v606_v40  ;;  %v1771_v47 = vadd.f32 %v1739_v14, %v1670_v51  ;;  %v1335_v49 = vmul.f32 %v3977_v19, %v3470_v11 }
  0x54   :  { %v303_v5 = vadd.f32 %v271_v7, %v202_v33  ;;  %v474_v6 = vmul.f32 %v4092_v54, %v3505_v23  ;;  %v1436_v32 = vmul.f32 %v3988_v8, %v3478_v13  ;;  %v1537_v15 = vmul.f32 %v4004_v58, %v3488_v17 }
  0x55   :  { %3302 = vmatmul.mubr.msk.f32.gmra.mrb[6].mxu1 %vm934_vm0, %v2175_v43  ;;  %v809_v46 = vadd.f32 %v777_v53, %v708_v2  ;;  %v1872_v18 = vadd.f32 %v1840_v61, %v1771_v47  ;;  %v2144_v19 = vmul.f32 %v4199_v3, %v3538_v37  ;;  %v575_v1 = vmul.f32 %v4097_v24, %v3514_v27  ;;  %v4262_v47 = vld [vmem:[%s5826_s0 + $0x249] sm:$0xff] }
  0x56   :  { %v405_v0 = vadd.f32 %v373_v41, %v303_v5  ;;  %v677_v8 = vmul.f32 %v3524_v30, %v4215_v20  ;;  %v1468_v58 = vadd.f32 %v1436_v32, %v1335_v49  ;;  %v1639_v4 = vmul.f32 %v4113_v55, %v3497_v21 }
  0x57   :  { %v910_v29 = vadd.f32 %v878_v22, %v809_v46  ;;  %v1974_v9 = vadd.f32 %v1942_v52, %v1872_v18  ;;  %v1740_v14 = vmul.f32 %v4126_v48, %v3505_v23  ;;  %v70_v35 = vmul.f32 %v4009_v16, %v3470_v11 }
  0x58   :  { %v506_v42 = vadd.f32 %v474_v6, %v405_v0  ;;  %v1569_v50 = vadd.f32 %v1537_v15, %v1468_v58  ;;  %v171_v53 = vmul.f32 %v4022_v38, %v3478_v13  ;;  %v272_v22 = vmul.f32 %v4027_v39, %v3488_v17  ;;  %v4249_v38 = vld [vmem:[%s5826_s0 + $0x248] sm:$0xff] }
  0x59   :  { %3240 = vmatprep.mubr.msk.f32.mxu0 %vm934_vm0, %v910_v29  ;;  %v2075_v16 = vadd.f32 %v2043_v60, %v1974_v9  ;;  %v778_v56 = vmul.f32 %v3533_v36, %v4228_v28  ;;  %v879_v7 = vmul.f32 %v3538_v37, %v4233_v12  ;;  %v1841_v57 = vmul.f32 %v4142_v63, %v3514_v27 }
  0x5a   :  { %v607_v40 = vadd.f32 %v575_v1, %v506_v42  ;;  %v1671_v51 = vadd.f32 %v1639_v4, %v1569_v50  ;;  %v203_v39 = vadd.f32 %v171_v53, %v70_v35  ;;  %v374_v61 = vmul.f32 %v4147_v31, %v3497_v21  ;;  %v4283_v1 = vld [vmem:[%s5826_s0 + $0xa8] sm:$0xff] }
  0x5b   :  { %v2176_v52 = vadd.f32 %v2144_v19, %v2075_v16  ;;  %v1943_v60 = vmul.f32 %v4249_v38, %v3524_v30  ;;  %v475_v33 = vmul.f32 %v4160_v26, %v3505_v23  ;;  %v1336_v41 = vmul.f32 %v4045_v44, %v3470_v11  ;;  %v4296_v35 = vld [vmem:[%s5826_s0 + $0xa9] sm:$0xff] }
  0x5c   :  { %v709_v43 = vadd.f32 %v677_v8, %v607_v40  ;;  %v1772_v2 = vadd.f32 %v1740_v14, %v1671_v51  ;;  %v304_v49 = vadd.f32 %v272_v22, %v203_v39  ;;  %v1437_v5 = vmul.f32 %v4050_v45, %v3478_v13  ;;  %v4278_v45 = vld [vmem:[%s5826_s0 + $0x24a] sm:$0xff]  ;;  %v4317_v51 = vld [vmem:[%s5826_s0 + $0x258] sm:$0xff] }
  0x5d   :  { %3304 = vmatprep.mubr.msk.f32.mxu1 %vm934_vm0, %v2176_v52  ;;  %v2044_v6 = vmul.f32 %v4262_v47, %v3533_v36  ;;  %v576_v32 = vmul.f32 %v4165_v34, %v3514_v27  ;;  %v1538_v44 = vmul.f32 %v4063_v25, %v3488_v17  ;;  %v1640_v15 = vmul.f32 %v4181_v62, %v3497_v21  ;;  %v4301_v42 = vld [vmem:[%s5826_s0 + $0xaa] sm:$0xff] }
  0x5e   :  { %v810_v46 = vadd.f32 %v778_v56, %v709_v43  ;;  %v1873_v18 = vadd.f32 %v1841_v57, %v1772_v2  ;;  %v406_v19 = vadd.f32 %v374_v61, %v304_v49  ;;  %v1469_v0 = vadd.f32 %v1437_v5, %v1336_v41  ;;  %v4335_v2 = vld [vmem:[%s5826_s0 + $0x25a] sm:$0xff] }
  0x5f   :  { %v2145_v25 = vmul.f32 %v4278_v45, %v3538_v37  ;;  %v678_v8 = vmul.f32 %v3524_v30, %v4283_v1  ;;  %v1741_v58 = vmul.f32 %v4186_v59, %v3505_v23  ;;  %v71_v4 = vmul.f32 %v4079_v10, %v3470_v11 }
  0x60   :  { %v911_v29 = vadd.f32 %v879_v7, %v810_v46  ;;  %v1975_v9 = vadd.f32 %v1943_v60, %v1873_v18  ;;  %v507_v14 = vadd.f32 %v475_v33, %v406_v19  ;;  %v1570_v50 = vadd.f32 %v1538_v44, %v1469_v0  ;;  %v4351_v46 = vld [vmem:[%s5826_s0 + $0xb0] sm:$0xff] }
  0x61   :  { %v779_v53 = vmul.f32 %v3533_v36, %v4296_v35  ;;  %v880_v10 = vmul.f32 %v3538_v37, %v4301_v42  ;;  %v172_v22 = vmul.f32 %v4092_v54, %v3478_v13  ;;  %v273_v16 = vmul.f32 %v4097_v24, %v3488_v17  ;;  %v4322_v54 = vld [vmem:[%s5826_s0 + $0x259] sm:$0xff] }
  0x62   :  { %3241 = vmatmul.mubr.msk.f32.gmra.mrb[8].mxu0 %vm934_vm0, %v911_v29  ;;  %v2076_v56 = vadd.f32 %v2044_v6, %v1975_v9  ;;  %v608_v7 = vadd.f32 %v576_v32, %v507_v14  ;;  %v1672_v57 = vadd.f32 %v1640_v15, %v1570_v50  ;;  %v1842_v40 = vmul.f32 %v4199_v3, %v3514_v27 }
  0x63   :  { %v1944_v24 = vmul.f32 %v4317_v51, %v3524_v30  ;;  %v2045_v39 = vmul.f32 %v4322_v54, %v3533_v36  ;;  %v204_v61 = vadd.f32 %v172_v22, %v71_v4  ;;  %v375_v52 = vmul.f32 %v4215_v20, %v3497_v21  ;;  %v4386_v4 = vld [vmem:[%s5827_s1 + $0x2] ss:$0 sm:$0xff] }
  0x64   :  { %v2177_v60 = vadd.f32 %v2145_v25, %v2076_v56  ;;  %v710_v33 = vadd.f32 %v678_v8, %v608_v7  ;;  %v1773_v41 = vadd.f32 %v1741_v58, %v1672_v57  ;;  %v1337_v43 = vmul.f32 %v4113_v55, %v3470_v11  ;;  %v4379_v58 = vld [vmem:[%s5827_s1 + $0x1] ss:$0 sm:$0xff]  ;;  %v4417_v7 = vld [vmem:[%s5827_s1 + $0x6] ss:$0 sm:$0xff] }
  0x65   :  { %v305_v49 = vadd.f32 %v273_v16, %v204_v61  ;;  %v476_v5 = vmul.f32 %v4228_v28, %v3505_v23  ;;  %v1438_v6 = vmul.f32 %v4126_v48, %v3478_v13  ;;  %v1539_v32 = vmul.f32 %v4142_v63, %v3488_v17 }
  0x66   :  { %3305 = vmatmul.mubr.msk.f32.gmra.mrb[8].mxu1 %vm934_vm0, %v2177_v60  ;;  %v811_v44 = vadd.f32 %v779_v53, %v710_v33  ;;  %v1874_v15 = vadd.f32 %v1842_v40, %v1773_v41  ;;  %v2146_v11 = vmul.f32 %v4335_v2, %v3538_v37  ;;  %v577_v55 = vmul.f32 %v4233_v12, %v3514_v27  ;;  %v4362_v27 = vld [vmem:[%s5827_s1] ss:$0 sm:$0xff]  ;;  %v4424_v40 = vld [vmem:[%s5827_s1 + $0x4] ss:$0 sm:$0xff] }
  0x67   :  { %v407_v18 = vadd.f32 %v375_v52, %v305_v49  ;;  %v679_v13 = vmul.f32 %v3524_v30, %v4351_v46  ;;  %v1470_v17 = vadd.f32 %v1438_v6, %v1337_v43  ;;  %v1641_v48 = vmul.f32 %v4249_v38, %v3497_v21  ;;  %v4369_v30 = vld [vmem:[%s5826_s0 + $0xb1] sm:$0xff]  ;;  %v4433_v60 = vld [vmem:[%s5826_s0 + $0x261] sm:$0xff] }
  0x68   :  { %v912_v63 = vadd.f32 %v880_v10, %v811_v44  ;;  %v1976_v19 = vadd.f32 %v1944_v24, %v1874_v15  ;;  %v1742_v0 = vmul.f32 %v4262_v47, %v3505_v23  ;;  %v72_v25 = vmul.f32 %v4362_v27, %v4147_v31  ;;  %v4374_v21 = vld [vmem:[%s5826_s0 + $0xb2] sm:$0xff]  ;;  %v4441_v43 = vld [vmem:[%s5827_s1 + $0x7] ss:$0 sm:$0xff] }
  0x69   :  { %v508_v8 = vadd.f32 %v476_v5, %v407_v18  ;;  %v1571_v23 = vadd.f32 %v1539_v32, %v1470_v17  ;;  %v173_v31 = vmul.f32 %v4379_v58, %v4160_v26  ;;  %v274_v29 = vmul.f32 %v4386_v4, %v4165_v34  ;;  %v4398_v26 = vld [vmem:[%s5827_s1 + $0x5] ss:$0 sm:$0xff] }
  0x6a   :  { %3243 = vmatprep.mubr.msk.f32.mxu0 %vm934_vm0, %v912_v63  ;;  %v2077_v9 = vadd.f32 %v2045_v39, %v1976_v19  ;;  %v780_v14 = vmul.f32 %v3533_v36, %v4369_v30  ;;  %v881_v50 = vmul.f32 %v3538_v37, %v4374_v21  ;;  %v1843_v53 = vmul.f32 %v4398_v26, %v4278_v45  ;;  %v4405_v34 = vld [vmem:[%s5826_s0 + $0x260] sm:$0xff] }
  0x6b   :  { %v609_v10 = vadd.f32 %v577_v55, %v508_v8  ;;  %v1673_v22 = vadd.f32 %v1641_v48, %v1571_v23  ;;  %v205_v16 = vadd.f32 %v173_v31, %v72_v25  ;;  %v4410_v36 = vld [vmem:[%s5827_s1 + $0x3] ss:$0 sm:$0xff]  ;;  %v1945_v57 = vmul.f32 %v4417_v7, %v4405_v34 }
  0x6c   :  { %v376_v37 = vmul.f32 %v4410_v36, %v4283_v1  ;;  %v2178_v56 = vadd.f32 %v2146_v11, %v2077_v9  ;;  %v477_v24 = vmul.f32 %v4424_v40, %v4296_v35  ;;  %v1338_v39 = vmul.f32 %v4362_v27, %v4181_v62  ;;  %v4454_v44 = vld [vmem:[%s5826_s0 + $0x262] sm:$0xff] }
  0x6d   :  { %v711_v61 = vadd.f32 %v679_v13, %v609_v10  ;;  %v1774_v52 = vadd.f32 %v1742_v0, %v1673_v22  ;;  %v306_v33 = vadd.f32 %v274_v29, %v205_v16  ;;  %v1439_v41 = vmul.f32 %v4379_v58, %v4186_v59  ;;  %v4459_v11 = vld [vmem:[%s5826_s0 + $0xc0] sm:$0xff]  ;;  %v4498_v22 = vld [vmem:[%s5826_s0 + $0x270] sm:$0xff] }
  0x6e   :  { %3307 = vmatprep.mubr.msk.f32.mxu1 %vm934_vm0, %v2178_v56  ;;  %v2046_v62 = vmul.f32 %v4441_v43, %v4433_v60  ;;  %v578_v49 = vmul.f32 %v4398_v26, %v4301_v42  ;;  %v1540_v5 = vmul.f32 %v4386_v4, %v4199_v3  ;;  %v1642_v6 = vmul.f32 %v4410_v36, %v4317_v51  ;;  %v4464_v3 = vld [vmem:[%s5827_s1 + $0x8] ss:$0 sm:$0xff] }
  0x6f   :  { %v812_v59 = vadd.f32 %v780_v14, %v711_v61  ;;  %v1875_v32 = vadd.f32 %v1843_v53, %v1774_v52  ;;  %v408_v15 = vadd.f32 %v376_v37, %v306_v33  ;;  %v1471_v55 = vadd.f32 %v1439_v41, %v1338_v39  ;;  %v4477_v25 = vld [vmem:[%s5826_s0 + $0xc1] sm:$0xff]  ;;  %v4516_v52 = vld [vmem:[%s5826_s0 + $0x272] sm:$0xff] }
  0x70   :  { %v2147_v18 = vmul.f32 %v4464_v3, %v4454_v44  ;;  %v680_v13 = vmul.f32 %v4417_v7, %v4459_v11  ;;  %v1743_v17 = vmul.f32 %v4424_v40, %v4322_v54  ;;  %v73_v48 = vmul.f32 %v4362_v27, %v4215_v20  ;;  %v4482_v8 = vld [vmem:[%s5826_s0 + $0xc2] sm:$0xff] }
  0x71   :  { %v913_v63 = vadd.f32 %v881_v50, %v812_v59  ;;  %v1977_v19 = vadd.f32 %v1945_v57, %v1875_v32  ;;  %v509_v0 = vadd.f32 %v477_v24, %v408_v15  ;;  %v1572_v23 = vadd.f32 %v1540_v5, %v1471_v55  ;;  %v4532_v32 = vld [vmem:[%s5826_s0 + $0xc8] sm:$0xff] }
  0x72   :  { %v781_v31 = vmul.f32 %v4441_v43, %v4477_v25  ;;  %v882_v20 = vmul.f32 %v4464_v3, %v4482_v8  ;;  %v174_v29 = vmul.f32 %v4379_v58, %v4228_v28  ;;  %v275_v9 = vmul.f32 %v4386_v4, %v4233_v12  ;;  %v4503_v28 = vld [vmem:[%s5826_s0 + $0x271] sm:$0xff] }
  0x73   :  { %3244 = vmatmul.mubr.msk.f32.gmra.mrb[10].mxu0 %vm934_vm0, %v913_v63  ;;  %v2078_v14 = vadd.f32 %v2046_v62, %v1977_v19  ;;  %v610_v50 = vadd.f32 %v578_v49, %v509_v0  ;;  %v1674_v53 = vadd.f32 %v1642_v6, %v1572_v23  ;;  %v1844_v10 = vmul.f32 %v4398_v26, %v4335_v2  ;;  %v4545_v19 = vld [vmem:[%s5826_s0 + $0xc9] sm:$0xff] }
  0x74   :  { %v1946_v12 = vmul.f32 %v4417_v7, %v4498_v22  ;;  %v2047_v16 = vmul.f32 %v4441_v43, %v4503_v28  ;;  %v206_v37 = vadd.f32 %v174_v29, %v73_v48  ;;  %v377_v56 = vmul.f32 %v4410_v36, %v4351_v46  ;;  %v4550_v0 = vld [vmem:[%s5826_s0 + $0xca] sm:$0xff] }
  0x75   :  { %v2179_v57 = vadd.f32 %v2147_v18, %v2078_v14  ;;  %v712_v24 = vadd.f32 %v680_v13, %v610_v50  ;;  %v1775_v39 = vadd.f32 %v1743_v17, %v1674_v53  ;;  %v1339_v61 = vmul.f32 %v4362_v27, %v4249_v38 }
  0x76   :  { %v307_v33 = vadd.f32 %v275_v9, %v206_v37  ;;  %v478_v41 = vmul.f32 %v4424_v40, %v4369_v30  ;;  %v1440_v62 = vmul.f32 %v4379_v58, %v4262_v47  ;;  %v1541_v49 = vmul.f32 %v4386_v4, %v4278_v45 }
  0x77   :  { %3308 = vmatmul.mubr.msk.f32.gmra.mrb[10].mxu1 %vm934_vm0, %v2179_v57  ;;  %v813_v5 = vadd.f32 %v781_v31, %v712_v24  ;;  %v1876_v6 = vadd.f32 %v1844_v10, %v1775_v39  ;;  %v2148_v38 = vmul.f32 %v4464_v3, %v4516_v52  ;;  %v579_v59 = vmul.f32 %v4398_v26, %v4374_v21  ;;  %v4579_v39 = vld [vmem:[%s5826_s0 + $0x279] sm:$0xff] }
  0x78   :  { %v409_v15 = vadd.f32 %v377_v56, %v307_v33  ;;  %v681_v47 = vmul.f32 %v4417_v7, %v4532_v32  ;;  %v1472_v45 = vadd.f32 %v1440_v62, %v1339_v61  ;;  %v1643_v55 = vmul.f32 %v4410_v36, %v4405_v34 }
  0x79   :  { %v914_v18 = vadd.f32 %v882_v20, %v813_v5  ;;  %v1978_v13 = vadd.f32 %v1946_v12, %v1876_v6  ;;  %v1744_v17 = vmul.f32 %v4424_v40, %v4433_v60  ;;  %v74_v48 = vmul.f32 %v4362_v27, %v4283_v1 }
  0x7a   :  { %v510_v63 = vadd.f32 %v478_v41, %v409_v15  ;;  %v1573_v23 = vadd.f32 %v1541_v49, %v1472_v45  ;;  %v175_v31 = vmul.f32 %v4379_v58, %v4296_v35  ;;  %v276_v20 = vmul.f32 %v4386_v4, %v4301_v42  ;;  %v4566_v35 = vld [vmem:[%s5826_s0 + $0x278] sm:$0xff] }
  0x7b   :  { %3246 = vmatprep.mubr.msk.f32.mxu0 %vm934_vm0, %v914_v18  ;;  %v2079_v1 = vadd.f32 %v2047_v16, %v1978_v13  ;;  %v782_v29 = vmul.f32 %v4441_v43, %v4545_v19  ;;  %v883_v9 = vmul.f32 %v4464_v3, %v4550_v0  ;;  %v1845_v14 = vmul.f32 %v4398_v26, %v4454_v44 }
  0x7c   :  { %v611_v50 = vadd.f32 %v579_v59, %v510_v63  ;;  %v1675_v53 = vadd.f32 %v1643_v55, %v1573_v23  ;;  %v207_v42 = vadd.f32 %v175_v31, %v74_v48  ;;  %v378_v10 = vmul.f32 %v4410_v36, %v4459_v11  ;;  %v4600_v59 = vld [vmem:[%s5826_s0 + $0xd8] sm:$0xff] }
  0x7d   :  { %v2180_v12 = vadd.f32 %v2148_v38, %v2079_v1  ;;  %v1947_v16 = vmul.f32 %v4417_v7, %v4566_v35  ;;  %v479_v37 = vmul.f32 %v4424_v40, %v4477_v25  ;;  %v1340_v56 = vmul.f32 %v4362_v27, %v4317_v51  ;;  %v4613_v48 = vld [vmem:[%s5826_s0 + $0xd9] sm:$0xff] }
  0x7e   :  { %v713_v57 = vadd.f32 %v681_v47, %v611_v50  ;;  %v1776_v24 = vadd.f32 %v1744_v17, %v1675_v53  ;;  %v308_v61 = vadd.f32 %v276_v20, %v207_v42  ;;  %v1441_v33 = vmul.f32 %v4379_v58, %v4322_v54  ;;  %v4595_v54 = vld [vmem:[%s5826_s0 + $0x27a] sm:$0xff]  ;;  %v4634_v53 = vld [vmem:[%s5826_s0 + $0x288] sm:$0xff] }
  0x7f   :  { %3310 = vmatprep.mubr.msk.f32.mxu1 %vm934_vm0, %v2180_v12  ;;  %v2048_v41 = vmul.f32 %v4441_v43, %v4579_v39  ;;  %v580_v62 = vmul.f32 %v4398_v26, %v4482_v8  ;;  %v1542_v51 = vmul.f32 %v4386_v4, %v4335_v2  ;;  %v1644_v49 = vmul.f32 %v4410_v36, %v4498_v22  ;;  %v4618_v63 = vld [vmem:[%s5826_s0 + $0xda] sm:$0xff] }
  0x80   :  { %v814_v5 = vadd.f32 %v782_v29, %v713_v57  ;;  %v1877_v6 = vadd.f32 %v1845_v14, %v1776_v24  ;;  %v410_v38 = vadd.f32 %v378_v10, %v308_v61  ;;  %v1473_v15 = vadd.f32 %v1441_v33, %v1340_v56  ;;  %v4652_v24 = vld [vmem:[%s5826_s0 + $0x28a] sm:$0xff] }
  0x81   :  { %v2149_v2 = vmul.f32 %v4464_v3, %v4595_v54  ;;  %v682_v47 = vmul.f32 %v4417_v7, %v4600_v59  ;;  %v1745_v45 = vmul.f32 %v4424_v40, %v4503_v28  ;;  %v75_v55 = vmul.f32 %v4362_v27, %v4351_v46 }
  0x82   :  { %v915_v18 = vadd.f32 %v883_v9, %v814_v5  ;;  %v1979_v13 = vadd.f32 %v1947_v16, %v1877_v6  ;;  %v511_v17 = vadd.f32 %v479_v37, %v410_v38  ;;  %v1574_v23 = vadd.f32 %v1542_v51, %v1473_v15  ;;  %v4668_v6 = vld [vmem:[%s5826_s0 + $0xe0] sm:$0xff] }
  0x83   :  { %v783_v31 = vmul.f32 %v4441_v43, %v4613_v48  ;;  %v884_v46 = vmul.f32 %v4464_v3, %v4618_v63  ;;  %v176_v20 = vmul.f32 %v4379_v58, %v4369_v30  ;;  %v277_v1 = vmul.f32 %v4386_v4, %v4374_v21  ;;  %v4639_v30 = vld [vmem:[%s5826_s0 + $0x289] sm:$0xff] }
  0x84   :  { %3247 = vmatmul.mubr.msk.f32.gmra.mrb[12].mxu0 %vm934_vm0, %v915_v18  ;;  %v2080_v29 = vadd.f32 %v2048_v41, %v1979_v13  ;;  %v612_v9 = vadd.f32 %v580_v62, %v511_v17  ;;  %v1676_v14 = vadd.f32 %v1644_v49, %v1574_v23  ;;  %v1846_v50 = vmul.f32 %v4398_v26, %v4516_v52  ;;  %v4681_v13 = vld [vmem:[%s5826_s0 + $0xe1] sm:$0xff] }
  0x85   :  { %v1948_v21 = vmul.f32 %v4417_v7, %v4634_v53  ;;  %v2049_v42 = vmul.f32 %v4441_v43, %v4639_v30  ;;  %v208_v10 = vadd.f32 %v176_v20, %v75_v55  ;;  %v379_v12 = vmul.f32 %v4410_v36, %v4532_v32  ;;  %v4686_v17 = vld [vmem:[%s5826_s0 + $0xe2] sm:$0xff] }
  0x86   :  { %v2181_v16 = vadd.f32 %v2149_v2, %v2080_v29  ;;  %v714_v37 = vadd.f32 %v682_v47, %v612_v9  ;;  %v1777_v56 = vadd.f32 %v1745_v45, %v1676_v14  ;;  %v1341_v57 = vmul.f32 %v4362_v27, %v4405_v34 }
  0x87   :  { %v309_v61 = vadd.f32 %v277_v1, %v208_v10  ;;  %v480_v33 = vmul.f32 %v4424_v40, %v4545_v19  ;;  %v1442_v41 = vmul.f32 %v4379_v58, %v4433_v60  ;;  %v1543_v62 = vmul.f32 %v4386_v4, %v4454_v44 }
  0x88   :  { %3311 = vmatmul.mubr.msk.f32.gmra.mrb[12].mxu1 %vm934_vm0, %v2181_v16  ;;  %v815_v51 = vadd.f32 %v783_v31, %v714_v37  ;;  %v1878_v49 = vadd.f32 %v1846_v50, %v1777_v56  ;;  %v2150_v34 = vmul.f32 %v4464_v3, %v4652_v24  ;;  %v581_v5 = vmul.f32 %v4398_v26, %v4550_v0  ;;  %v4715_v56 = vld [vmem:[%s5826_s0 + $0x291] sm:$0xff] }
  0x89   :  { %v411_v38 = vadd.f32 %v379_v12, %v309_v61  ;;  %v683_v60 = vmul.f32 %v4417_v7, %v4668_v6  ;;  %v1474_v44 = vadd.f32 %v1442_v41, %v1341_v57  ;;  %v1645_v15 = vmul.f32 %v4410_v36, %v4566_v35 }
  0x8a   :  { %v916_v2 = vadd.f32 %v884_v46, %v815_v51  ;;  %v1980_v47 = vadd.f32 %v1948_v21, %v1878_v49  ;;  %v1746_v45 = vmul.f32 %v4424_v40, %v4579_v39  ;;  %v76_v55 = vmul.f32 %v4362_v27, %v4459_v11 }
  0x8b   :  { %v512_v18 = vadd.f32 %v480_v33, %v411_v38  ;;  %v1575_v23 = vadd.f32 %v1543_v62, %v1474_v44  ;;  %v177_v31 = vmul.f32 %v4379_v58, %v4477_v25  ;;  %v278_v46 = vmul.f32 %v4386_v4, %v4482_v8  ;;  %v4702_v25 = vld [vmem:[%s5826_s0 + $0x290] sm:$0xff] }
  0x8c   :  { %3249 = vmatprep.mubr.msk.f32.mxu0 %vm934_vm0, %v916_v2  ;;  %v2081_v11 = vadd.f32 %v2049_v42, %v1980_v47  ;;  %v784_v20 = vmul.f32 %v4441_v43, %v4681_v13  ;;  %v885_v1 = vmul.f32 %v4464_v3, %v4686_v17  ;;  %v1847_v29 = vmul.f32 %v4398_v26, %v4595_v54 }
  0x8d   :  { %v613_v9 = vadd.f32 %v581_v5, %v512_v18  ;;  %v1677_v14 = vadd.f32 %v1645_v15, %v1575_v23  ;;  %v209_v8 = vadd.f32 %v177_v31, %v76_v55  ;;  %v380_v50 = vmul.f32 %v4410_v36, %v4600_v59  ;;  %v4736_v5 = vld [vmem:[%s5826_s0 + $0xf0] sm:$0xff] }
  0x8e   :  { %v2182_v21 = vadd.f32 %v2150_v34, %v2081_v11  ;;  %v1949_v42 = vmul.f32 %v4417_v7, %v4702_v25  ;;  %v481_v10 = vmul.f32 %v4424_v40, %v4613_v48  ;;  %v1342_v12 = vmul.f32 %v4362_v27, %v4498_v22  ;;  %v4749_v55 = vld [vmem:[%s5826_s0 + $0xf1] sm:$0xff] }
  0x8f   :  { %v715_v16 = vadd.f32 %v683_v60, %v613_v9  ;;  %v1778_v37 = vadd.f32 %v1746_v45, %v1677_v14  ;;  %v310_v57 = vadd.f32 %v278_v46, %v209_v8  ;;  %v1443_v61 = vmul.f32 %v4379_v58, %v4503_v28  ;;  %v4731_v28 = vld [vmem:[%s5826_s0 + $0x292] sm:$0xff]  ;;  %v4770_v14 = vld [vmem:[%s5826_s0 + $0x2a0] sm:$0xff] }
  0x90   :  { %3313 = vmatprep.mubr.msk.f32.mxu1 %vm934_vm0, %v2182_v21  ;;  %v2050_v33 = vmul.f32 %v4441_v43, %v4715_v56  ;;  %v582_v41 = vmul.f32 %v4398_v26, %v4618_v63  ;;  %v1544_v22 = vmul.f32 %v4386_v4, %v4516_v52  ;;  %v1646_v62 = vmul.f32 %v4410_v36, %v4634_v53  ;;  %v4754_v18 = vld [vmem:[%s5826_s0 + $0xf2] sm:$0xff] }
  0x91   :  { %v816_v51 = vadd.f32 %v784_v20, %v715_v16  ;;  %v1879_v49 = vadd.f32 %v1847_v29, %v1778_v37  ;;  %v412_v34 = vadd.f32 %v380_v50, %v310_v57  ;;  %v1475_v38 = vadd.f32 %v1443_v61, %v1342_v12  ;;  %v4788_v37 = vld [vmem:[%s5826_s0 + $0x2a2] sm:$0xff] }
  0x92   :  { %v2151_v52 = vmul.f32 %v4464_v3, %v4731_v28  ;;  %v684_v60 = vmul.f32 %v4417_v7, %v4736_v5  ;;  %v1747_v44 = vmul.f32 %v4424_v40, %v4639_v30  ;;  %v77_v15 = vmul.f32 %v4362_v27, %v4532_v32 }
  0x93   :  { %v917_v2 = vadd.f32 %v885_v1, %v816_v51  ;;  %v1981_v47 = vadd.f32 %v1949_v42, %v1879_v49  ;;  %v513_v45 = vadd.f32 %v481_v10, %v412_v34  ;;  %v1576_v23 = vadd.f32 %v1544_v22, %v1475_v38  ;;  %v4804_v49 = vld [vmem:[%s5826_s0 + $0xf8] sm:$0xff] }
  0x94   :  { %v785_v31 = vmul.f32 %v4441_v43, %v4749_v55  ;;  %v886_v32 = vmul.f32 %v4464_v3, %v4754_v18  ;;  %v178_v46 = vmul.f32 %v4379_v58, %v4545_v19  ;;  %v279_v11 = vmul.f32 %v4386_v4, %v4550_v0  ;;  %v4775_v19 = vld [vmem:[%s5826_s0 + $0x2a1] sm:$0xff] }
  0x95   :  { %3250 = vmatmul.mubr.msk.f32.gmra.mrb[14].mxu0 %vm934_vm0, %v917_v2  ;;  %v2082_v20 = vadd.f32 %v2050_v33, %v1981_v47  ;;  %v614_v1 = vadd.f32 %v582_v41, %v513_v45  ;;  %v1678_v29 = vadd.f32 %v1646_v62, %v1576_v23  ;;  %v1848_v9 = vmul.f32 %v4398_v26, %v4652_v24  ;;  %v4817_v47 = vld [vmem:[%s5826_s0 + $0xf9] sm:$0xff] }
  0x96   :  { %v1950_v0 = vmul.f32 %v4417_v7, %v4770_v14  ;;  %v2051_v8 = vmul.f32 %v4441_v43, %v4775_v19  ;;  %v210_v50 = vadd.f32 %v178_v46, %v77_v15  ;;  %v381_v21 = vmul.f32 %v4410_v36, %v4668_v6  ;;  %v4822_v45 = vld [vmem:[%s5826_s0 + $0xfa] sm:$0xff] }
  0x97   :  { %v2183_v42 = vadd.f32 %v2151_v52, %v2082_v20  ;;  %v716_v10 = vadd.f32 %v684_v60, %v614_v1  ;;  %v1779_v12 = vadd.f32 %v1747_v44, %v1678_v29  ;;  %v1343_v16 = vmul.f32 %v4362_v27, %v4566_v35 }
  0x98   :  { %v311_v57 = vadd.f32 %v279_v11, %v210_v50  ;;  %v482_v61 = vmul.f32 %v4424_v40, %v4681_v13  ;;  %v1444_v33 = vmul.f32 %v4379_v58, %v4579_v39  ;;  %v1545_v41 = vmul.f32 %v4386_v4, %v4595_v54 }
  0x99   :  { %3314 = vmatmul.mubr.msk.f32.gmra.mrb[14].mxu1 %vm934_vm0, %v2183_v42  ;;  %v817_v22 = vadd.f32 %v785_v31, %v716_v10  ;;  %v1880_v62 = vadd.f32 %v1848_v9, %v1779_v12  ;;  %v2152_v35 = vmul.f32 %v4464_v3, %v4788_v37  ;;  %v583_v51 = vmul.f32 %v4398_v26, %v4686_v17  ;;  %v4851_v12 = vld [vmem:[%s5826_s0 + $0x2a9] sm:$0xff] }
  0x9a   :  { %v413_v34 = vadd.f32 %v381_v21, %v311_v57  ;;  %v685_v39 = vmul.f32 %v4417_v7, %v4804_v49  ;;  %v1476_v54 = vadd.f32 %v1444_v33, %v1343_v16  ;;  %v1647_v38 = vmul.f32 %v4410_v36, %v4702_v25 }
  0x9b   :  { %v918_v52 = vadd.f32 %v886_v32, %v817_v22  ;;  %v1982_v60 = vadd.f32 %v1950_v0, %v1880_v62  ;;  %v1748_v44 = vmul.f32 %v4424_v40, %v4715_v56  ;;  %v78_v15 = vmul.f32 %v4362_v27, %v4600_v59 }
  0x9c   :  { %v514_v2 = vadd.f32 %v482_v61, %v413_v34  ;;  %v1577_v23 = vadd.f32 %v1545_v41, %v1476_v54  ;;  %v179_v31 = vmul.f32 %v4379_v58, %v4613_v48  ;;  %v280_v32 = vmul.f32 %v4386_v4, %v4618_v63  ;;  %v4838_v48 = vld [vmem:[%s5826_s0 + $0x2a8] sm:$0xff] }
  0x9d   :  { %3252 = vmatprep.mubr.msk.f32.mxu0 %vm934_vm0, %v918_v52  ;;  %v2083_v59 = vadd.f32 %v2051_v8, %v1982_v60  ;;  %v786_v46 = vmul.f32 %v4441_v43, %v4817_v47  ;;  %v887_v11 = vmul.f32 %v4464_v3, %v4822_v45  ;;  %v1849_v20 = vmul.f32 %v4398_v26, %v4731_v28 }
  0x9e   :  { %v615_v1 = vadd.f32 %v583_v51, %v514_v2  ;;  %v1679_v29 = vadd.f32 %v1647_v38, %v1577_v23  ;;  %v211_v63 = vadd.f32 %v179_v31, %v78_v15  ;;  %v382_v9 = vmul.f32 %v4410_v36, %v4736_v5  ;;  %v4872_v51 = vld [vmem:[%s5826_s0 + $0x108] sm:$0xff] }
  0x9f   :  { %v2184_v0 = vadd.f32 %v2152_v35, %v2083_v59  ;;  %v1951_v8 = vmul.f32 %v4417_v7, %v4838_v48  ;;  %v483_v50 = vmul.f32 %v4424_v40, %v4749_v55  ;;  %v1344_v21 = vmul.f32 %v4362_v27, %v4634_v53  ;;  %v4885_v15 = vld [vmem:[%s5826_s0 + $0x109] sm:$0xff] }
  0xa0   :  { %v717_v42 = vadd.f32 %v685_v39, %v615_v1  ;;  %v1780_v10 = vadd.f32 %v1748_v44, %v1679_v29  ;;  %v312_v16 = vadd.f32 %v280_v32, %v211_v63  ;;  %v1445_v57 = vmul.f32 %v4379_v58, %v4639_v30  ;;  %v4867_v30 = vld [vmem:[%s5826_s0 + $0x2aa] sm:$0xff]  ;;  %v4906_v29 = vld [vmem:[%s5826_s0 + $0x2b8] sm:$0xff] }
  0xa1   :  { %3316 = vmatprep.mubr.msk.f32.mxu1 %vm934_vm0, %v2184_v0  ;;  %v2052_v61 = vmul.f32 %v4441_v43, %v4851_v12  ;;  %v584_v33 = vmul.f32 %v4398_v26, %v4754_v18  ;;  %v1546_v53 = vmul.f32 %v4386_v4, %v4652_v24  ;;  %v1648_v41 = vmul.f32 %v4410_v36, %v4770_v14  ;;  %v4890_v2 = vld [vmem:[%s5826_s0 + $0x10a] sm:$0xff] }
  0xa2   :  { %v818_v22 = vadd.f32 %v786_v46, %v717_v42  ;;  %v1881_v62 = vadd.f32 %v1849_v20, %v1780_v10  ;;  %v414_v35 = vadd.f32 %v382_v9, %v312_v16  ;;  %v1477_v34 = vadd.f32 %v1445_v57, %v1344_v21  ;;  %v4924_v10 = vld [vmem:[%s5826_s0 + $0x2ba] sm:$0xff] }
  0xa3   :  { %v2153_v24 = vmul.f32 %v4464_v3, %v4867_v30  ;;  %v686_v39 = vmul.f32 %v4417_v7, %v4872_v51  ;;  %v1749_v54 = vmul.f32 %v4424_v40, %v4775_v19  ;;  %v79_v38 = vmul.f32 %v4362_v27, %v4668_v6 }
  0xa4   :  { %v919_v52 = vadd.f32 %v887_v11, %v818_v22  ;;  %v1983_v60 = vadd.f32 %v1951_v8, %v1881_v62  ;;  %v515_v44 = vadd.f32 %v483_v50, %v414_v35  ;;  %v1578_v23 = vadd.f32 %v1546_v53, %v1477_v34  ;;  %v4940_v62 = vld [vmem:[%s5826_s0 + $0x110] sm:$0xff] }
  0xa5   :  { %v787_v31 = vmul.f32 %v4441_v43, %v4885_v15  ;;  %v888_v6 = vmul.f32 %v4464_v3, %v4890_v2  ;;  %v180_v32 = vmul.f32 %v4379_v58, %v4681_v13  ;;  %v281_v59 = vmul.f32 %v4386_v4, %v4686_v17  ;;  %v4911_v13 = vld [vmem:[%s5826_s0 + $0x2b9] sm:$0xff] }
  0xa6   :  { %3253 = vmatmul.mubr.msk.f32.gmra.mrb[16].mxu0 %vm934_vm0, %v919_v52  ;;  %v2084_v46 = vadd.f32 %v2052_v61, %v1983_v60  ;;  %v616_v11 = vadd.f32 %v584_v33, %v515_v44  ;;  %v1680_v20 = vadd.f32 %v1648_v41, %v1578_v23  ;;  %v1850_v1 = vmul.f32 %v4398_v26, %v4788_v37  ;;  %v4953_v60 = vld [vmem:[%s5826_s0 + $0x111] sm:$0xff] }
  0xa7   :  { %v1952_v17 = vmul.f32 %v4417_v7, %v4906_v29  ;;  %v2053_v63 = vmul.f32 %v4441_v43, %v4911_v13  ;;  %v212_v9 = vadd.f32 %v180_v32, %v79_v38  ;;  %v383_v0 = vmul.f32 %v4410_v36, %v4804_v49  ;;  %v4958_v44 = vld [vmem:[%s5826_s0 + $0x112] sm:$0xff] }
  0xa8   :  { %v2185_v8 = vadd.f32 %v2153_v24, %v2084_v46  ;;  %v718_v50 = vadd.f32 %v686_v39, %v616_v11  ;;  %v1781_v21 = vadd.f32 %v1749_v54, %v1680_v20  ;;  %v1345_v42 = vmul.f32 %v4362_v27, %v4702_v25 }
  0xa9   :  { %v313_v16 = vadd.f32 %v281_v59, %v212_v9  ;;  %v484_v57 = vmul.f32 %v4424_v40, %v4817_v47  ;;  %v1446_v61 = vmul.f32 %v4379_v58, %v4715_v56  ;;  %v1547_v33 = vmul.f32 %v4386_v4, %v4731_v28 }
  0xaa   :  { %3317 = vmatmul.mubr.msk.f32.gmra.mrb[16].mxu1 %vm934_vm0, %v2185_v8  ;;  %v819_v53 = vadd.f32 %v787_v31, %v718_v50  ;;  %v1882_v41 = vadd.f32 %v1850_v1, %v1781_v21  ;;  %v2154_v25 = vmul.f32 %v4464_v3, %v4924_v10  ;;  %v585_v22 = vmul.f32 %v4398_v26, %v4822_v45  ;;  %v4987_v21 = vld [vmem:[%s5826_s0 + $0x2c1] sm:$0xff] }
  0xab   :  { %v415_v35 = vadd.f32 %v383_v0, %v313_v16  ;;  %v687_v56 = vmul.f32 %v4417_v7, %v4940_v62  ;;  %v1478_v28 = vadd.f32 %v1446_v61, %v1345_v42  ;;  %v1649_v34 = vmul.f32 %v4410_v36, %v4838_v48 }
  0xac   :  { %v920_v24 = vadd.f32 %v888_v6, %v819_v53  ;;  %v1984_v39 = vadd.f32 %v1952_v17, %v1882_v41  ;;  %v1750_v54 = vmul.f32 %v4424_v40, %v4851_v12  ;;  %v80_v38 = vmul.f32 %v4362_v27, %v4736_v5 }
  0xad   :  { %v516_v52 = vadd.f32 %v484_v57, %v415_v35  ;;  %v1579_v23 = vadd.f32 %v1547_v33, %v1478_v28  ;;  %v181_v31 = vmul.f32 %v4379_v58, %v4749_v55  ;;  %v282_v6 = vmul.f32 %v4386_v4, %v4754_v18  ;;  %v4974_v55 = vld [vmem:[%s5826_s0 + $0x2c0] sm:$0xff] }
  0xae   :  { %3255 = vmatprep.mubr.msk.f32.mxu0 %vm934_vm0, %v920_v24  ;;  %v2085_v5 = vadd.f32 %v2053_v63, %v1984_v39  ;;  %v788_v32 = vmul.f32 %v4441_v43, %v4953_v60  ;;  %v889_v59 = vmul.f32 %v4464_v3, %v4958_v44  ;;  %v1851_v46 = vmul.f32 %v4398_v26, %v4867_v30 }
  0xaf   :  { %v617_v11 = vadd.f32 %v585_v22, %v516_v52  ;;  %v1681_v20 = vadd.f32 %v1649_v34, %v1579_v23  ;;  %v213_v18 = vadd.f32 %v181_v31, %v80_v38  ;;  %v384_v1 = vmul.f32 %v4410_v36, %v4872_v51  ;;  %v5008_v22 = vld [vmem:[%s5826_s0 + $0x120] sm:$0xff] }
  0xb0   :  { %v2186_v17 = vadd.f32 %v2154_v25, %v2085_v5  ;;  %v1953_v63 = vmul.f32 %v4417_v7, %v4974_v55  ;;  %v485_v9 = vmul.f32 %v4424_v40, %v4885_v15  ;;  %v1346_v0 = vmul.f32 %v4362_v27, %v4770_v14  ;;  %v5021_v38 = vld [vmem:[%s5826_s0 + $0x121] sm:$0xff] }
  0xb1   :  { %v719_v8 = vadd.f32 %v687_v56, %v617_v11  ;;  %v1782_v50 = vadd.f32 %v1750_v54, %v1681_v20  ;;  %v314_v42 = vadd.f32 %v282_v6, %v213_v18  ;;  %v1447_v16 = vmul.f32 %v4379_v58, %v4775_v19  ;;  %v5003_v19 = vld [vmem:[%s5826_s0 + $0x2c2] sm:$0xff]  ;;  %v5042_v20 = vld [vmem:[%s5826_s0 + $0x2d0] sm:$0xff] }
  0xb2   :  { %3319 = vmatprep.mubr.msk.f32.mxu1 %vm934_vm0, %v2186_v17  ;;  %v2054_v57 = vmul.f32 %v4441_v43, %v4987_v21  ;;  %v586_v61 = vmul.f32 %v4398_v26, %v4890_v2  ;;  %v1548_v14 = vmul.f32 %v4386_v4, %v4788_v37  ;;  %v1650_v33 = vmul.f32 %v4410_v36, %v4906_v29  ;;  %v5026_v52 = vld [vmem:[%s5826_s0 + $0x122] sm:$0xff] }
  0xb3   :  { %v820_v53 = vadd.f32 %v788_v32, %v719_v8  ;;  %v1883_v41 = vadd.f32 %v1851_v46, %v1782_v50  ;;  %v416_v25 = vadd.f32 %v384_v1, %v314_v42  ;;  %v1479_v35 = vadd.f32 %v1447_v16, %v1346_v0  ;;  %v5060_v50 = vld [vmem:[%s5826_s0 + $0x2d2] sm:$0xff] }
  0xb4   :  { %v2155_v37 = vmul.f32 %v4464_v3, %v5003_v19  ;;  %v688_v56 = vmul.f32 %v4417_v7, %v5008_v22  ;;  %v1751_v28 = vmul.f32 %v4424_v40, %v4911_v13  ;;  %v81_v34 = vmul.f32 %v4362_v27, %v4804_v49 }
  0xb5   :  { %v921_v24 = vadd.f32 %v889_v59, %v820_v53  ;;  %v1985_v39 = vadd.f32 %v1953_v63, %v1883_v41  ;;  %v517_v54 = vadd.f32 %v485_v9, %v416_v25  ;;  %v1580_v23 = vadd.f32 %v1548_v14, %v1479_v35  ;;  %v5076_v41 = vld [vmem:[%s5826_s0 + $0x128] sm:$0xff] }
  0xb6   :  { %v789_v31 = vmul.f32 %v4441_v43, %v5021_v38  ;;  %v890_v49 = vmul.f32 %v4464_v3, %v5026_v52  ;;  %v182_v6 = vmul.f32 %v4379_v58, %v4817_v47  ;;  %v283_v5 = vmul.f32 %v4386_v4, %v4822_v45  ;;  %v5047_v47 = vld [vmem:[%s5826_s0 + $0x2d1] sm:$0xff] }
  0xb7   :  { %3256 = vmatmul.mubr.msk.f32.gmra.mrb[18].mxu0 %vm934_vm0, %v921_v24  ;;  %v2086_v32 = vadd.f32 %v2054_v57, %v1985_v39  ;;  %v618_v59 = vadd.f32 %v586_v61, %v517_v54  ;;  %v1682_v46 = vadd.f32 %v1650_v33, %v1580_v23  ;;  %v1852_v11 = vmul.f32 %v4398_v26, %v4924_v10  ;;  %v5089_v39 = vld [vmem:[%s5826_s0 + $0x129] sm:$0xff] }
  0xb8   :  { %v1954_v45 = vmul.f32 %v4417_v7, %v5042_v20  ;;  %v2055_v18 = vmul.f32 %v4441_v43, %v5047_v47  ;;  %v214_v1 = vadd.f32 %v182_v6, %v81_v34  ;;  %v385_v17 = vmul.f32 %v4410_v36, %v4940_v62  ;;  %v5094_v54 = vld [vmem:[%s5826_s0 + $0x12a] sm:$0xff] }
  0xb9   :  { %v2187_v63 = vadd.f32 %v2155_v37, %v2086_v32  ;;  %v720_v9 = vadd.f32 %v688_v56, %v618_v59  ;;  %v1783_v0 = vadd.f32 %v1751_v28, %v1682_v46  ;;  %v1347_v8 = vmul.f32 %v4362_v27, %v4838_v48 }
  0xba   :  { %v315_v42 = vadd.f32 %v283_v5, %v214_v1  ;;  %v486_v16 = vmul.f32 %v4424_v40, %v4953_v60  ;;  %v1448_v57 = vmul.f32 %v4379_v58, %v4851_v12  ;;  %v1549_v61 = vmul.f32 %v4386_v4, %v4867_v30 }
  0xbb   :  { %3320 = vmatmul.mubr.msk.f32.gmra.mrb[18].mxu1 %vm934_vm0, %v2187_v63  ;;  %v821_v14 = vadd.f32 %v789_v31, %v720_v9  ;;  %v1884_v33 = vadd.f32 %v1852_v11, %v1783_v0  ;;  %v2156_v48 = vmul.f32 %v4464_v3, %v5060_v50  ;;  %v587_v53 = vmul.f32 %v4398_v26, %v4958_v44  ;;  %v5123_v0 = vld [vmem:[%s5826_s0 + $0x2d9] sm:$0xff] }
  0xbc   :  { %v417_v25 = vadd.f32 %v385_v17, %v315_v42  ;;  %v689_v12 = vmul.f32 %v4417_v7, %v5076_v41  ;;  %v1480_v30 = vadd.f32 %v1448_v57, %v1347_v8  ;;  %v1651_v35 = vmul.f32 %v4410_v36, %v4974_v55 }
  0xbd   :  { %v922_v37 = vadd.f32 %v890_v49, %v821_v14  ;;  %v1986_v56 = vadd.f32 %v1954_v45, %v1884_v33  ;;  %v1752_v28 = vmul.f32 %v4424_v40, %v4987_v21  ;;  %v82_v34 = vmul.f32 %v4362_v27, %v4872_v51 }
  0xbe   :  { %v518_v24 = vadd.f32 %v486_v16, %v417_v25  ;;  %v1581_v23 = vadd.f32 %v1549_v61, %v1480_v30  ;;  %v183_v31 = vmul.f32 %v4379_v58, %v4885_v15  ;;  %v284_v49 = vmul.f32 %v4386_v4, %v4890_v2  ;;  %v5110_v15 = vld [vmem:[%s5826_s0 + $0x2d8] sm:$0xff] }
  0xbf   :  { %3258 = vmatprep.mubr.msk.f32.mxu0 %vm934_vm0, %v922_v37  ;;  %v2087_v51 = vadd.f32 %v2055_v18, %v1986_v56  ;;  %v790_v6 = vmul.f32 %v4441_v43, %v5089_v39  ;;  %v891_v5 = vmul.f32 %v4464_v3, %v5094_v54  ;;  %v1853_v32 = vmul.f32 %v4398_v26, %v5003_v19 }
  0xc0   :  { %v619_v59 = vadd.f32 %v587_v53, %v518_v24  ;;  %v1683_v46 = vadd.f32 %v1651_v35, %v1581_v23  ;;  %v215_v2 = vadd.f32 %v183_v31, %v82_v34  ;;  %v386_v11 = vmul.f32 %v4410_v36, %v5008_v22  ;;  %v5144_v53 = vld [vmem:[%s5826_s0 + $0x138] sm:$0xff] }
  0xc1   :  { %v2188_v45 = vadd.f32 %v2156_v48, %v2087_v51  ;;  %v1955_v18 = vmul.f32 %v4417_v7, %v5110_v15  ;;  %v487_v1 = vmul.f32 %v4424_v40, %v5021_v38  ;;  %v1348_v17 = vmul.f32 %v4362_v27, %v4906_v29  ;;  %v5157_v34 = vld [vmem:[%s5826_s0 + $0x139] sm:$0xff] }
  0xc2   :  { %v721_v63 = vadd.f32 %v689_v12, %v619_v59  ;;  %v1784_v9 = vadd.f32 %v1752_v28, %v1683_v46  ;;  %v316_v8 = vadd.f32 %v284_v49, %v215_v2  ;;  %v1449_v42 = vmul.f32 %v4379_v58, %v4911_v13  ;;  %v5139_v13 = vld [vmem:[%s5826_s0 + $0x2da] sm:$0xff]  ;;  %v5178_v46 = vld [vmem:[%s5826_s0 + $0x2e8] sm:$0xff] }
  0xc3   :  { %3322 = vmatprep.mubr.msk.f32.mxu1 %vm934_vm0, %v2188_v45  ;;  %v2056_v16 = vmul.f32 %v4441_v43, %v5123_v0  ;;  %v588_v57 = vmul.f32 %v4398_v26, %v5026_v52  ;;  %v1550_v29 = vmul.f32 %v4386_v4, %v4924_v10  ;;  %v1652_v61 = vmul.f32 %v4410_v36, %v5042_v20  ;;  %v5162_v24 = vld [vmem:[%s5826_s0 + $0x13a] sm:$0xff] }
  0xc4   :  { %v822_v14 = vadd.f32 %v790_v6, %v721_v63  ;;  %v1885_v33 = vadd.f32 %v1853_v32, %v1784_v9  ;;  %v418_v48 = vadd.f32 %v386_v11, %v316_v8  ;;  %v1481_v25 = vadd.f32 %v1449_v42, %v1348_v17  ;;  %v5196_v9 = vld [vmem:[%s5826_s0 + $0x2ea] sm:$0xff] }
  0xc5   :  { %v2157_v10 = vmul.f32 %v4464_v3, %v5139_v13  ;;  %v690_v12 = vmul.f32 %v4417_v7, %v5144_v53  ;;  %v1753_v30 = vmul.f32 %v4424_v40, %v5047_v47  ;;  %v83_v35 = vmul.f32 %v4362_v27, %v4940_v62 }
  0xc6   :  { %v923_v37 = vadd.f32 %v891_v5, %v822_v14  ;;  %v1987_v56 = vadd.f32 %v1955_v18, %v1885_v33  ;;  %v519_v28 = vadd.f32 %v487_v1, %v418_v48  ;;  %v1582_v23 = vadd.f32 %v1550_v29, %v1481_v25  ;;  %v5212_v33 = vld [vmem:[%s5826_s0 + $0x140] sm:$0xff] }
  0xc7   :  { %v791_v31 = vmul.f32 %v4441_v43, %v5157_v34  ;;  %v892_v62 = vmul.f32 %v4464_v3, %v5162_v24  ;;  %v184_v49 = vmul.f32 %v4379_v58, %v4953_v60  ;;  %v285_v51 = vmul.f32 %v4386_v4, %v4958_v44  ;;  %v5183_v60 = vld [vmem:[%s5826_s0 + $0x2e9] sm:$0xff] }
  0xc8   :  { %3259 = vmatmul.mubr.msk.f32.gmra.mrb[20].mxu0 %vm934_vm0, %v923_v37  ;;  %v2088_v6 = vadd.f32 %v2056_v16, %v1987_v56  ;;  %v620_v5 = vadd.f32 %v588_v57, %v519_v28  ;;  %v1684_v32 = vadd.f32 %v1652_v61, %v1582_v23  ;;  %v1854_v59 = vmul.f32 %v4398_v26, %v5060_v50  ;;  %v5225_v56 = vld [vmem:[%s5826_s0 + $0x141] sm:$0xff] }
  0xc9   :  { %v1956_v44 = vmul.f32 %v4417_v7, %v5178_v46  ;;  %v2057_v2 = vmul.f32 %v4441_v43, %v5183_v60  ;;  %v216_v11 = vadd.f32 %v184_v49, %v83_v35  ;;  %v387_v45 = vmul.f32 %v4410_v36, %v5076_v41  ;;  %v5230_v28 = vld [vmem:[%s5826_s0 + $0x142] sm:$0xff] }
  0xca   :  { %v2189_v18 = vadd.f32 %v2157_v10, %v2088_v6  ;;  %v722_v1 = vadd.f32 %v690_v12, %v620_v5  ;;  %v1785_v17 = vadd.f32 %v1753_v30, %v1684_v32  ;;  %v1349_v63 = vmul.f32 %v4362_v27, %v4974_v55 }
  0xcb   :  { %v317_v8 = vadd.f32 %v285_v51, %v216_v11  ;;  %v488_v42 = vmul.f32 %v4424_v40, %v5089_v39  ;;  %v1450_v16 = vmul.f32 %v4379_v58, %v4987_v21  ;;  %v1551_v57 = vmul.f32 %v4386_v4, %v5003_v19 }
  0xcc   :  { %3323 = vmatmul.mubr.msk.f32.gmra.mrb[20].mxu1 %vm934_vm0, %v2189_v18  ;;  %v823_v29 = vadd.f32 %v791_v31, %v722_v1  ;;  %v1886_v61 = vadd.f32 %v1854_v59, %v1785_v17  ;;  %v2158_v55 = vmul.f32 %v4464_v3, %v5196_v9  ;;  %v589_v14 = vmul.f32 %v4398_v26, %v5094_v54  ;;  %v5279_v18 = vld [vmem:[%s5827_s1 + $0x5] ss:$0 sm:$0xff]  ;;  %v5286_v17 = vld [vmem:[%s5827_s1 + $0x2] ss:$0 sm:$0xff] }
  0xcd   :  { %v419_v48 = vadd.f32 %v387_v45, %v317_v8  ;;  %v691_v21 = vmul.f32 %v4417_v7, %v5212_v33  ;;  %v1482_v19 = vadd.f32 %v1450_v16, %v1349_v63  ;;  %v1653_v25 = vmul.f32 %v4410_v36, %v5110_v15  ;;  %v5300_v16 = vld [vmem:[%s5826_s0 + $0x2f2] sm:$0xff] }
  0xce   :  { %v924_v10 = vadd.f32 %v892_v62, %v823_v29  ;;  %v1988_v12 = vadd.f32 %v1956_v44, %v1886_v61  ;;  %v1754_v30 = vmul.f32 %v4424_v40, %v5123_v0  ;;  %v84_v35 = vmul.f32 %v4362_v27, %v5008_v22 }
  0xcf   :  { %v520_v37 = vadd.f32 %v488_v42, %v419_v48  ;;  %v1583_v23 = vadd.f32 %v1551_v57, %v1482_v19  ;;  %v185_v31 = vmul.f32 %v4379_v58, %v5021_v38  ;;  %v286_v62 = vmul.f32 %v4386_v4, %v5026_v52  ;;  %v5246_v58 = vld [vmem:[%s5826_s0 + $0x2f0] sm:$0xff]  ;;  %v5319_v48 = vld [vmem:[%s5827_s1 + $0x4] ss:$0 sm:$0xff] }
  0xd0   :  { %3261 = vmatprep.mubr.msk.f32.mxu0 %vm934_vm0, %v924_v10  ;;  %v2089_v27 = vadd.f32 %v2057_v2, %v1988_v12  ;;  %v792_v22 = vmul.f32 %v4441_v43, %v5225_v56  ;;  %v893_v49 = vmul.f32 %v4464_v3, %v5230_v28  ;;  %v1855_v51 = vmul.f32 %v4398_v26, %v5139_v13  ;;  %v5257_v26 = vld [vmem:[%s5827_s1] ss:$0 sm:$0xff]  ;;  %v5328_v12 = vld [vmem:[%s5826_s0 + $0x151] sm:$0xff] }
  0xd1   :  { %v621_v6 = vadd.f32 %v589_v14, %v520_v37  ;;  %v1685_v5 = vadd.f32 %v1653_v25, %v1583_v23  ;;  %v217_v4 = vadd.f32 %v185_v31, %v84_v35  ;;  %v388_v38 = vmul.f32 %v4410_v36, %v5144_v53  ;;  %v5264_v36 = vld [vmem:[%s5826_s0 + $0x2f1] sm:$0xff]  ;;  %v5338_v37 = vld [vmem:[%s5827_s1 + $0x7] ss:$0 sm:$0xff]  ;;  %v5345_v23 = vld [vmem:[%s5827_s1 + $0x8] ss:$0 sm:$0xff] }
  0xd2   :  { %v2190_v52 = vadd.f32 %v2158_v55, %v2089_v27  ;;  %v1957_v32 = vmul.f32 %v4417_v7, %v5246_v58  ;;  %v489_v59 = vmul.f32 %v4424_v40, %v5157_v34  ;;  %v1350_v44 = vmul.f32 %v5257_v26, %v5042_v20  ;;  %v5269_v7 = vld [vmem:[%s5827_s1 + $0x1] ss:$0 sm:$0xff]  ;;  %v5312_v55 = vld [vmem:[%s5827_s1 + $0x6] ss:$0 sm:$0xff] }
  0xd3   :  { %v723_v2 = vadd.f32 %v691_v21, %v621_v6  ;;  %v1786_v11 = vadd.f32 %v1754_v30, %v1685_v5  ;;  %v318_v45 = vadd.f32 %v286_v62, %v217_v4  ;;  %v1451_v40 = vmul.f32 %v5269_v7, %v5047_v47  ;;  %v5333_v30 = vld [vmem:[%s5826_s0 + $0x152] sm:$0xff]  ;;  %v5359_v5 = vld [vmem:[%s5826_s0 + $0x300] sm:$0xff] }
  0xd4   :  { %3325 = vmatprep.mubr.msk.f32.mxu1 %vm934_vm0, %v2190_v52  ;;  %v2058_v20 = vmul.f32 %v4441_v43, %v5264_v36  ;;  %v590_v1 = vmul.f32 %v5279_v18, %v5162_v24  ;;  %v1552_v47 = vmul.f32 %v5286_v17, %v5060_v50  ;;  %v5293_v43 = vld [vmem:[%s5827_s1 + $0x3] ss:$0 sm:$0xff]  ;;  %v5305_v50 = vld [vmem:[%s5826_s0 + $0x150] sm:$0xff]  ;;  %v2159_v61 = vmul.f32 %v4464_v3, %v5300_v16 }
  0xd5   :  { %v1654_v63 = vmul.f32 %v5293_v43, %v5178_v46  ;;  %v824_v8 = vadd.f32 %v792_v22, %v723_v2  ;;  %v1887_v42 = vadd.f32 %v1855_v51, %v1786_v11  ;;  %v420_v57 = vadd.f32 %v388_v38, %v318_v45  ;;  %v5377_v11 = vld [vmem:[%s5826_s0 + $0x302] sm:$0xff] }
  0xd6   :  { %v1483_v29 = vadd.f32 %v1451_v40, %v1350_v44  ;;  %v692_v14 = vmul.f32 %v5312_v55, %v5305_v50  ;;  %v1755_v21 = vmul.f32 %v5319_v48, %v5183_v60  ;;  %v85_v19 = vmul.f32 %v5257_v26, %v5076_v41 }
  0xd7   :  { %v925_v3 = vadd.f32 %v893_v49, %v824_v8  ;;  %v1989_v25 = vadd.f32 %v1957_v32, %v1887_v42  ;;  %v521_v10 = vadd.f32 %v489_v59, %v420_v57  ;;  %v793_v41 = vmul.f32 %v5338_v37, %v5328_v12  ;;  %v5393_v42 = vld [vmem:[%s5826_s0 + $0x158] sm:$0xff] }
  0xd8   :  { %v1584_v35 = vadd.f32 %v1552_v47, %v1483_v29  ;;  %v894_v31 = vmul.f32 %v5345_v23, %v5333_v30  ;;  %v186_v62 = vmul.f32 %v5269_v7, %v5089_v39  ;;  %v287_v27 = vmul.f32 %v5286_v17, %v5094_v54  ;;  %v5364_v39 = vld [vmem:[%s5826_s0 + $0x301] sm:$0xff] }
  0xd9   :  { %3262 = vmatmul.mubr.msk.f32.gmra.mrb[22].mxu0 %vm934_vm0, %v925_v3  ;;  %v2090_v22 = vadd.f32 %v2058_v20, %v1989_v25  ;;  %v622_v49 = vadd.f32 %v590_v1, %v521_v10  ;;  %v1856_v6 = vmul.f32 %v5279_v18, %v5196_v9  ;;  %v1958_v54 = vmul.f32 %v5312_v55, %v5359_v5  ;;  %v5406_v25 = vld [vmem:[%s5826_s0 + $0x159] sm:$0xff] }
  0xda   :  { %v1686_v51 = vadd.f32 %v1654_v63, %v1584_v35  ;;  %v2059_v4 = vmul.f32 %v5338_v37, %v5364_v39  ;;  %v218_v38 = vadd.f32 %v186_v62, %v85_v19  ;;  %v389_v52 = vmul.f32 %v5293_v43, %v5212_v33  ;;  %v5411_v10 = vld [vmem:[%s5826_s0 + $0x15a] sm:$0xff] }
  0xdb   :  { %v2191_v32 = vadd.f32 %v2159_v61, %v2090_v22  ;;  %v724_v59 = vadd.f32 %v692_v14, %v622_v49  ;;  %v1351_v2 = vmul.f32 %v5257_v26, %v5110_v15  ;;  %v490_v40 = vmul.f32 %v5319_v48, %v5225_v56 }
  0xdc   :  { %v1787_v44 = vadd.f32 %v1755_v21, %v1686_v51  ;;  %v319_v45 = vadd.f32 %v287_v27, %v218_v38  ;;  %v1452_v20 = vmul.f32 %v5269_v7, %v5123_v0  ;;  %v1553_v1 = vmul.f32 %v5286_v17, %v5139_v13 }
  0xdd   :  { %3326 = vmatmul.mubr.msk.f32.gmra.mrb[22].mxu1 %vm934_vm0, %v2191_v32  ;;  %v825_v47 = vadd.f32 %v793_v41, %v724_v59  ;;  %v2160_v15 = vmul.f32 %v5345_v23, %v5377_v11  ;;  %v591_v8 = vmul.f32 %v5279_v18, %v5230_v28  ;;  %v693_v0 = vmul.f32 %v5312_v55, %v5393_v42 }
  0xde   :  { %v1888_v63 = vadd.f32 %v1856_v6, %v1787_v44  ;;  %v421_v57 = vadd.f32 %v389_v52, %v319_v45  ;;  %v1484_v13 = vadd.f32 %v1452_v20, %v1351_v2  ;;  %v1655_v29 = vmul.f32 %v5293_v43, %v5246_v58  ;;  %v5440_v44 = vld [vmem:[%s5826_s0 + $0x309] sm:$0xff] }
  0xdf   :  { %v926_v61 = vadd.f32 %v894_v31, %v825_v47  ;;  %v1756_v21 = vmul.f32 %v5319_v48, %v5264_v36  ;;  %v86_v19 = vmul.f32 %v5257_v26, %v5144_v53  ;;  %v187_v41 = vmul.f32 %v5269_v7, %v5157_v34  ;;  %v5427_v34 = vld [vmem:[%s5826_s0 + $0x308] sm:$0xff] }
  0xe0   :  { %v1990_v14 = vadd.f32 %v1958_v54, %v1888_v63  ;;  %v522_v3 = vadd.f32 %v490_v40, %v421_v57  ;;  %v1585_v35 = vadd.f32 %v1553_v1, %v1484_v13  ;;  %v288_v31 = vmul.f32 %v5286_v17, %v5162_v24 }
  0xe1   :  { %3264 = vmatprep.mubr.msk.f32.mxu0 %vm934_vm0, %v926_v61  ;;  %v794_v62 = vmul.f32 %v5338_v37, %v5406_v25  ;;  %v895_v27 = vmul.f32 %v5345_v23, %v5411_v10  ;;  %v1857_v22 = vmul.f32 %v5279_v18, %v5300_v16  ;;  %v219_v24 = vadd.f32 %v187_v41, %v86_v19  ;;  %v5474_v19 = vld [vmem:[%s5826_s0 + $0x169] sm:$0xff] }
  0xe2   :  { %v2091_v53 = vadd.f32 %v2059_v4, %v1990_v14  ;;  %v623_v49 = vadd.f32 %v591_v8, %v522_v3  ;;  %v1687_v51 = vadd.f32 %v1655_v29, %v1585_v35  ;;  %v390_v6 = vmul.f32 %v5293_v43, %v5305_v50  ;;  %v5461_v8 = vld [vmem:[%s5826_s0 + $0x168] sm:$0xff] }
  0xe3   :  { %v1959_v4 = vmul.f32 %v5312_v55, %v5427_v34  ;;  %v491_v38 = vmul.f32 %v5319_v48, %v5328_v12  ;;  %v1352_v52 = vmul.f32 %v5257_v26, %v5178_v46  ;;  %v320_v2 = vadd.f32 %v288_v31, %v219_v24  ;;  %v5479_v3 = vld [vmem:[%s5826_s0 + $0x16a] sm:$0xff] }
  0xe4   :  { %v2192_v54 = vadd.f32 %v2160_v15, %v2091_v53  ;;  %v725_v32 = vadd.f32 %v693_v0, %v623_v49  ;;  %v1788_v59 = vadd.f32 %v1756_v21, %v1687_v51  ;;  %v1453_v45 = vmul.f32 %v5269_v7, %v5183_v60  ;;  %v5456_v60 = vld [vmem:[%s5826_s0 + $0x30a] sm:$0xff]  ;;  %v5495_v51 = vld [vmem:[%s5826_s0 + $0x318] sm:$0xff] }
  0xe5   :  { %v2060_v40 = vmul.f32 %v5338_v37, %v5440_v44  ;;  %v592_v20 = vmul.f32 %v5279_v18, %v5333_v30  ;;  %v1554_v46 = vmul.f32 %v5286_v17, %v5196_v9  ;;  %v1656_v1 = vmul.f32 %v5293_v43, %v5359_v5 }
  0xe6   :  { %3328 = vmatprep.mubr.msk.f32.mxu1 %vm934_vm0, %v2192_v54  ;;  %v826_v47 = vadd.f32 %v794_v62, %v725_v32  ;;  %v1889_v63 = vadd.f32 %v1857_v22, %v1788_v59  ;;  %v422_v15 = vadd.f32 %v390_v6, %v320_v2  ;;  %v1485_v57 = vadd.f32 %v1453_v45, %v1352_v52  ;;  %v5513_v59 = vld [vmem:[%s5826_s0 + $0x31a] sm:$0xff] }
  0xe7   :  { %v2161_v9 = vmul.f32 %v5345_v23, %v5456_v60  ;;  %v694_v0 = vmul.f32 %v5312_v55, %v5461_v8  ;;  %v1757_v13 = vmul.f32 %v5319_v48, %v5364_v39  ;;  %v87_v29 = vmul.f32 %v5257_v26, %v5212_v33 }
  0xe8   :  { %v927_v61 = vadd.f32 %v895_v27, %v826_v47  ;;  %v1991_v14 = vadd.f32 %v1959_v4, %v1889_v63  ;;  %v523_v21 = vadd.f32 %v491_v38, %v422_v15  ;;  %v1586_v35 = vadd.f32 %v1554_v46, %v1485_v57  ;;  %v5529_v63 = vld [vmem:[%s5826_s0 + $0x170] sm:$0xff] }
  0xe9   :  { %v795_v41 = vmul.f32 %v5338_v37, %v5474_v19  ;;  %v896_v33 = vmul.f32 %v5345_v23, %v5479_v3  ;;  %v188_v31 = vmul.f32 %v5269_v7, %v5225_v56  ;;  %v289_v53 = vmul.f32 %v5286_v17, %v5230_v28  ;;  %v5500_v56 = vld [vmem:[%s5826_s0 + $0x319] sm:$0xff] }
  0xea   :  { %3265 = vmatmul.mubr.msk.f32.gmra.mrb[24].mxu0 %vm934_vm0, %v927_v61  ;;  %v2092_v62 = vadd.f32 %v2060_v40, %v1991_v14  ;;  %v624_v27 = vadd.f32 %v592_v20, %v523_v21  ;;  %v1688_v22 = vadd.f32 %v1656_v1, %v1586_v35  ;;  %v1858_v49 = vmul.f32 %v5279_v18, %v5377_v11  ;;  %v5542_v14 = vld [vmem:[%s5826_s0 + $0x171] sm:$0xff] }
  0xeb   :  { %v1960_v28 = vmul.f32 %v5312_v55, %v5495_v51  ;;  %v2061_v24 = vmul.f32 %v5338_v37, %v5500_v56  ;;  %v220_v6 = vadd.f32 %v188_v31, %v87_v29  ;;  %v391_v54 = vmul.f32 %v5293_v43, %v5393_v42  ;;  %v5547_v21 = vld [vmem:[%s5826_s0 + $0x172] sm:$0xff] }
  0xec   :  { %v2193_v4 = vadd.f32 %v2161_v9, %v2092_v62  ;;  %v726_v38 = vadd.f32 %v694_v0, %v624_v27  ;;  %v1789_v52 = vadd.f32 %v1757_v13, %v1688_v22  ;;  %v1353_v32 = vmul.f32 %v5257_v26, %v5246_v58 }
  0xed   :  { %v321_v2 = vadd.f32 %v289_v53, %v220_v6  ;;  %v492_v45 = vmul.f32 %v5319_v48, %v5406_v25  ;;  %v1454_v40 = vmul.f32 %v5269_v7, %v5264_v36  ;;  %v1555_v20 = vmul.f32 %v5286_v17, %v5300_v16 }
  0xee   :  { %3329 = vmatmul.mubr.msk.f32.gmra.mrb[24].mxu1 %vm934_vm0, %v2193_v4  ;;  %v827_v46 = vadd.f32 %v795_v41, %v726_v38  ;;  %v1890_v1 = vadd.f32 %v1858_v49, %v1789_v52  ;;  %v2162_v58 = vmul.f32 %v5345_v23, %v5513_v59  ;;  %v593_v47 = vmul.f32 %v5279_v18, %v5411_v10 }
  0xef   :  { %v423_v15 = vadd.f32 %v391_v54, %v321_v2  ;;  %v695_v36 = vmul.f32 %v5312_v55, %v5529_v63  ;;  %v1486_v16 = vadd.f32 %v1454_v40, %v1353_v32  ;;  %v1657_v57 = vmul.f32 %v5293_v43, %v5427_v34  ;;  %v5576_v2 = vld [vmem:[%s5826_s0 + $0x321] sm:$0xff] }
  0xf0   :  { %v928_v9 = vadd.f32 %v896_v33, %v827_v46  ;;  %v1992_v0 = vadd.f32 %v1960_v28, %v1890_v1  ;;  %v1758_v13 = vmul.f32 %v5319_v48, %v5440_v44  ;;  %v88_v29 = vmul.f32 %v5257_v26, %v5305_v50 }
  0xf1   :  { %v524_v61 = vadd.f32 %v492_v45, %v423_v15  ;;  %v1587_v35 = vadd.f32 %v1555_v20, %v1486_v16  ;;  %v189_v41 = vmul.f32 %v5269_v7, %v5328_v12  ;;  %v290_v33 = vmul.f32 %v5286_v17, %v5333_v30  ;;  %v5563_v12 = vld [vmem:[%s5826_s0 + $0x320] sm:$0xff] }
  0xf2   :  { %3267 = vmatprep.mubr.msk.f32.mxu0 %vm934_vm0, %v928_v9  ;;  %v2093_v50 = vadd.f32 %v2061_v24, %v1992_v0  ;;  %v796_v31 = vmul.f32 %v5338_v37, %v5542_v14  ;;  %v897_v53 = vmul.f32 %v5345_v23, %v5547_v21  ;;  %v1859_v62 = vmul.f32 %v5279_v18, %v5456_v60  ;;  %v5597_v16 = vld [vmem:[%s5826_s0 + $0x180] sm:$0xff] }
  0xf3   :  { %v3230_v27 = vpop.f32.mrb[0].mxu0  ;;  %v625_v22 = vadd.f32 %v593_v47, %v524_v61  ;;  %v1689_v49 = vadd.f32 %v1657_v57, %v1587_v35  ;;  %v221_v30 = vadd.f32 %v189_v41, %v88_v29  ;;  %v392_v28 = vmul.f32 %v5293_v43, %v5461_v8 }
  0xf4   :  { %1257 = vst [vmem:[#allocation2 + $0x8] sm:$0xff] %v3230_v27  ;;  %v1097_v24 = vpop.f32.mrb[1].mxu0  ;;  %v2194_v6 = vadd.f32 %v2162_v58, %v2093_v50  ;;  %v1961_v54 = vmul.f32 %v5312_v55, %v5563_v12  ;;  %v493_v4 = vmul.f32 %v5319_v48, %v5474_v19  ;;  %v1354_v38 = vmul.f32 %v5257_v26, %v5359_v5  ;;  %v5615_v50 = vld [vmem:[%s5826_s0 + $0x182] sm:$0xff] }
  0xf5   :  { %1256 = vst [vmem:[#allocation2] sm:$0xff] %v1097_v24  ;;  %v727_v52 = vadd.f32 %v695_v36, %v625_v22  ;;  %v1790_v32 = vadd.f32 %v1758_v13, %v1689_v49  ;;  %v322_v45 = vadd.f32 %v290_v33, %v221_v30  ;;  %v1455_v40 = vmul.f32 %v5269_v7, %v5364_v39  ;;  %v5592_v39 = vld [vmem:[%s5826_s0 + $0x322] sm:$0xff]  ;;  %v5631_v24 = vld [vmem:[%s5826_s0 + $0x330] sm:$0xff] }
  0xf6   :  { %3331 = vmatprep.mubr.msk.f32.mxu1 %vm934_vm0, %v2194_v6  ;;  %v2062_v20 = vmul.f32 %v5338_v37, %v5576_v2  ;;  %v594_v5 = vmul.f32 %v5279_v18, %v5479_v3  ;;  %v1556_v46 = vmul.f32 %v5286_v17, %v5377_v11  ;;  %v1658_v1 = vmul.f32 %v5293_v43, %v5495_v51  ;;  %v3294_v58 = vpop.f32.mrb[0].mxu1  ;;  %v5610_v33 = vld [vmem:[%s5826_s0 + $0x181] sm:$0xff] }
  0xf7   :  { %v828_v47 = vadd.f32 %v796_v31, %v727_v52  ;;  %v1891_v15 = vadd.f32 %v1859_v62, %v1790_v32  ;;  %v424_v36 = vadd.f32 %v392_v28, %v322_v45  ;;  %v1487_v57 = vadd.f32 %v1455_v40, %v1354_v38  ;;  %2523 = vst [vmem:[#allocation2 + $0x108] sm:$0xff] %v3294_v58  ;;  %v2362_v11 = vpop.f32.mrb[1].mxu1  ;;  %v5649_v40 = vld [vmem:[%s5826_s0 + $0x332] sm:$0xff] }
  0xf8   :  { %v2163_v9 = vmul.f32 %v5345_v23, %v5592_v39  ;;  %v696_v0 = vmul.f32 %v5312_v55, %v5597_v16  ;;  %v1759_v13 = vmul.f32 %v5319_v48, %v5500_v56  ;;  %v89_v29 = vmul.f32 %v5257_v26, %v5393_v42  ;;  %2522 = vst [vmem:[#allocation2 + $0x100] sm:$0xff] %v2362_v11 }
  0xf9   :  { %v929_v61 = vadd.f32 %v897_v53, %v828_v47  ;;  %v1993_v35 = vadd.f32 %v1961_v54, %v1891_v15  ;;  %v525_v41 = vadd.f32 %v493_v4, %v424_v36  ;;  %v1588_v31 = vadd.f32 %v1556_v46, %v1487_v57  ;;  %v5665_v36 = vld [vmem:[%s5826_s0 + $0x188] sm:$0xff] }
  0xfa   :  { %v797_v62 = vmul.f32 %v5338_v37, %v5610_v33  ;;  %v898_v42 = vmul.f32 %v5345_v23, %v5615_v50  ;;  %v190_v53 = vmul.f32 %v5269_v7, %v5406_v25  ;;  %v291_v27 = vmul.f32 %v5286_v17, %v5411_v10  ;;  %v5636_v25 = vld [vmem:[%s5826_s0 + $0x331] sm:$0xff] }
  0xfb   :  { %3268 = vmatmul.mubr.msk.f32.gmra.mrb[26].mxu0 %vm934_vm0, %v929_v61  ;;  %v2094_v22 = vadd.f32 %v2062_v20, %v1993_v35  ;;  %v626_v49 = vadd.f32 %v594_v5, %v525_v41  ;;  %v1690_v30 = vadd.f32 %v1658_v1, %v1588_v31  ;;  %v1860_v28 = vmul.f32 %v5279_v18, %v5513_v59  ;;  %v5678_v35 = vld [vmem:[%s5826_s0 + $0x189] sm:$0xff] }
  0xfc   :  { %v1962_v10 = vmul.f32 %v5312_v55, %v5631_v24  ;;  %v2063_v6 = vmul.f32 %v5338_v37, %v5636_v25  ;;  %v222_v54 = vadd.f32 %v190_v53, %v89_v29  ;;  %v393_v4 = vmul.f32 %v5293_v43, %v5529_v63  ;;  %v5683_v41 = vld [vmem:[%s5826_s0 + $0x18a] sm:$0xff] }
  0xfd   :  { %v2195_v38 = vadd.f32 %v2163_v9, %v2094_v22  ;;  %v728_v52 = vadd.f32 %v696_v0, %v626_v49  ;;  %v1791_v32 = vadd.f32 %v1759_v13, %v1690_v30  ;;  %v1355_v45 = vmul.f32 %v5257_v26, %v5427_v34 }
  0xfe   :  { %v323_v20 = vadd.f32 %v291_v27, %v222_v54  ;;  %v494_v5 = vmul.f32 %v5319_v48, %v5542_v14  ;;  %v1456_v46 = vmul.f32 %v5269_v7, %v5440_v44  ;;  %v1557_v1 = vmul.f32 %v5286_v17, %v5456_v60 }
  0xff   :  { %3332 = vmatmul.mubr.msk.f32.gmra.mrb[26].mxu1 %vm934_vm0, %v2195_v38  ;;  %v829_v58 = vadd.f32 %v797_v62, %v728_v52  ;;  %v1892_v47 = vadd.f32 %v1860_v28, %v1791_v32  ;;  %v2164_v34 = vmul.f32 %v5345_v23, %v5649_v40  ;;  %v595_v15 = vmul.f32 %v5279_v18, %v5547_v21 }
 0x100   :  { %v425_v57 = vadd.f32 %v393_v4, %v323_v20  ;;  %v697_v44 = vmul.f32 %v5312_v55, %v5665_v36  ;;  %v1488_v60 = vadd.f32 %v1456_v46, %v1355_v45  ;;  %v1659_v11 = vmul.f32 %v5293_v43, %v5563_v12  ;;  %v5712_v20 = vld [vmem:[%s5826_s0 + $0x339] sm:$0xff] }
 0x101   :  { %v930_v9 = vadd.f32 %v898_v42, %v829_v58  ;;  %v1994_v0 = vadd.f32 %v1962_v10, %v1892_v47  ;;  %v1760_v13 = vmul.f32 %v5319_v48, %v5576_v2  ;;  %v90_v29 = vmul.f32 %v5257_v26, %v5461_v8 }
 0x102   :  { %v526_v61 = vadd.f32 %v494_v5, %v425_v57  ;;  %v1589_v31 = vadd.f32 %v1557_v1, %v1488_v60  ;;  %v191_v62 = vmul.f32 %v5269_v7, %v5474_v19  ;;  %v292_v42 = vmul.f32 %v5286_v17, %v5479_v3  ;;  %v3233_v53 = vpop.f32.mrb[2].mxu0  ;;  %v5699_v3 = vld [vmem:[%s5826_s0 + $0x338] sm:$0xff] }
 0x103   :  { %3270 = vmatprep.mubr.msk.f32.mxu0 %vm934_vm0, %v930_v9  ;;  %v2095_v8 = vadd.f32 %v2063_v6, %v1994_v0  ;;  %v798_v27 = vmul.f32 %v5338_v37, %v5678_v35  ;;  %v899_v22 = vmul.f32 %v5345_v23, %v5683_v41  ;;  %v1861_v49 = vmul.f32 %v5279_v18, %v5592_v39  ;;  %v1107_v30 = vpop.f32.mrb[3].mxu0 }
 0x104   :  { %1259 = vst [vmem:[#allocation2 + $0x18] sm:$0xff] %v3233_v53  ;;  %v627_v28 = vadd.f32 %v595_v15, %v526_v61  ;;  %v1691_v19 = vadd.f32 %v1659_v11, %v1589_v31  ;;  %v223_v10 = vadd.f32 %v191_v62, %v90_v29  ;;  %v394_v6 = vmul.f32 %v5293_v43, %v5597_v16  ;;  %v2702_v16 = vld [vmem:[%s5826_s0 + $0x198] sm:$0xff]  ;;  %v3031_v62 = vld [vmem:[%s5826_s0 + $0x348] sm:$0xff] }
 0x105   :  { %1258 = vst [vmem:[#allocation2 + $0x10] sm:$0xff] %v1107_v30  ;;  %v2196_v54 = vadd.f32 %v2164_v34, %v2095_v8  ;;  %v1963_v4 = vmul.f32 %v5312_v55, %v5699_v3  ;;  %v495_v38 = vmul.f32 %v5319_v48, %v5610_v33  ;;  %v1356_v52 = vmul.f32 %v5257_v26, %v5495_v51  ;;  %v2768_v61 = vld [vmem:[%s5826_s0 + $0x19a] sm:$0xff] }
 0x106   :  { %v729_v32 = vadd.f32 %v697_v44, %v627_v28  ;;  %v1792_v45 = vadd.f32 %v1760_v13, %v1691_v19  ;;  %v324_v5 = vadd.f32 %v292_v42, %v223_v10  ;;  %v1457_v46 = vmul.f32 %v5269_v7, %v5500_v56  ;;  %v5731_v56 = vld [vmem:[%s5826_s0 + $0x33a] sm:$0xff]  ;;  %v3064_v28 = vld [vmem:[%s5826_s0 + $0x349] sm:$0xff] }
 0x107   :  { %3334 = vmatprep.mubr.msk.f32.mxu1 %vm934_vm0, %v2196_v54  ;;  %v2064_v51 = vmul.f32 %v5338_v37, %v5712_v20  ;;  %v596_v33 = vmul.f32 %v5279_v18, %v5615_v50  ;;  %v1558_v1 = vmul.f32 %v5286_v17, %v5513_v59  ;;  %v1660_v58 = vmul.f32 %v5293_v43, %v5631_v24  ;;  %v3297_v47 = vpop.f32.mrb[2].mxu1  ;;  %v2735_v44 = vld [vmem:[%s5826_s0 + $0x199] sm:$0xff] }
 0x108   :  { %v830_v34 = vadd.f32 %v798_v27, %v729_v32  ;;  %v1893_v15 = vadd.f32 %v1861_v49, %v1792_v45  ;;  %v426_v57 = vadd.f32 %v394_v6, %v324_v5  ;;  %v1489_v50 = vadd.f32 %v1457_v46, %v1356_v52  ;;  %2525 = vst [vmem:[#allocation2 + $0x118] sm:$0xff] %v3297_v47  ;;  %v2372_v60 = vpop.f32.mrb[3].mxu1  ;;  %v2736_v46 = vld [vmem:[%s5826_s0 + $0x1a1] sm:$0xff] }
 0x109   :  { %v2165_v59 = vmul.f32 %v5345_v23, %v5731_v56  ;;  %v698_v24 = vmul.f32 %v5312_v55, %v2702_v16  ;;  %v1761_v11 = vmul.f32 %v5319_v48, %v5636_v25  ;;  %v91_v9 = vmul.f32 %v5257_v26, %v5529_v63  ;;  %2524 = vst [vmem:[#allocation2 + $0x110] sm:$0xff] %v2372_v60 }
 0x10a   :  { %v931_v0 = vadd.f32 %v899_v22, %v830_v34  ;;  %v1995_v13 = vadd.f32 %v1963_v4, %v1893_v15  ;;  %v527_v29 = vadd.f32 %v495_v38, %v426_v57  ;;  %v1590_v31 = vadd.f32 %v1558_v1, %v1489_v50  ;;  %v3032_v34 = vld [vmem:[%s5826_s0 + $0x350] sm:$0xff] }
 0x10b   :  { %v799_v42 = vmul.f32 %v5338_v37, %v2735_v44  ;;  %v192_v25 = vmul.f32 %v5269_v7, %v5542_v14  ;;  %v293_v63 = vmul.f32 %v5286_v17, %v5547_v21  ;;  %v1862_v22 = vmul.f32 %v5279_v18, %v5649_v40  ;;  %v3097_v40 = vld [vmem:[%s5826_s0 + $0x34a] sm:$0xff] }
 0x10c   :  { %3271 = vmatmul.mubr.msk.f32.gmra.mrb[28].mxu0 %vm934_vm0, %v931_v0  ;;  %v2096_v53 = vadd.f32 %v2064_v51, %v1995_v13  ;;  %v628_v8 = vadd.f32 %v596_v33, %v527_v29  ;;  %v1692_v27 = vadd.f32 %v1660_v58, %v1590_v31  ;;  %v900_v49 = vmul.f32 %v5345_v23, %v2768_v61  ;;  %v3065_v50 = vld [vmem:[%s5826_s0 + $0x351] sm:$0xff] }
 0x10d   :  { %v1964_v30 = vmul.f32 %v5312_v55, %v3031_v62  ;;  %v224_v14 = vadd.f32 %v192_v25, %v91_v9  ;;  %v395_v21 = vmul.f32 %v5293_v43, %v5665_v36  ;;  %v1357_v54 = vmul.f32 %v5257_v26, %v5563_v12  ;;  %v2703_v12 = vld [vmem:[%s5826_s0 + $0x1a0] sm:$0xff]  ;;  %v3098_v0 = vld [vmem:[%s5826_s0 + $0x352] sm:$0xff] }
 0x10e   :  { %v2197_v19 = vadd.f32 %v2165_v59, %v2096_v53  ;;  %v730_v10 = vadd.f32 %v698_v24, %v628_v8  ;;  %v1793_v6 = vadd.f32 %v1761_v11, %v1692_v27  ;;  %v496_v38 = vmul.f32 %v5319_v48, %v5678_v35 }
 0x10f   :  { %v325_v4 = vadd.f32 %v293_v63, %v224_v14  ;;  %v1458_v52 = vmul.f32 %v5269_v7, %v5576_v2  ;;  %v1559_v36 = vmul.f32 %v5286_v17, %v5592_v39  ;;  %v2065_v26 = vmul.f32 %v5338_v37, %v3064_v28 }
 0x110   :  { %3335 = vmatmul.mubr.msk.f32.gmra.mrb[28].mxu1 %vm934_vm0, %v2197_v19  ;;  %v831_v32 = vadd.f32 %v799_v42, %v730_v10  ;;  %v1894_v45 = vadd.f32 %v1862_v22, %v1793_v6  ;;  %v597_v35 = vmul.f32 %v5279_v18, %v5683_v41  ;;  %v1661_v7 = vmul.f32 %v5293_v43, %v5699_v3  ;;  %v2769_v3 = vld [vmem:[%s5826_s0 + $0x1a2] sm:$0xff]  ;;  %s3417_s0 = smov [#allocation2]  }
 0x111   :  { %v427_v5 = vadd.f32 %v395_v21, %v325_v4  ;;  %v1490_v16 = vadd.f32 %v1458_v52, %v1357_v54  ;;  %v2166_v39 = vmul.f32 %v5345_v23, %v3097_v40  ;;  %v699_v1 = vmul.f32 %v5312_v55, %v2703_v12  ;;  %s2559_s7 = sshll.u32 %s3417_s0, 4  ;;  %s2560_s7 = int_to_ptr.vmem [resolvable:$true] %s2559_s7 }
 0x112   :  { %v932_v2 = vadd.f32 %v900_v49, %v831_v32  ;;  %v1996_v17 = vadd.f32 %v1964_v30, %v1894_v45  ;;  %v3236_v51 = vpop.f32.mrb[4].mxu0  ;;  %v1762_v41 = vmul.f32 %v5319_v48, %v5712_v20  ;;  %v800_v57 = vmul.f32 %v5338_v37, %v2736_v46  ;;  %s3393_s8 = scalar_lea.vmem %s2560_s7, 8192  ;;  %p3398_p1 = scmp.lt.s32.totalorder %s2560_s7, %s2560_s7 }
 0x113   :  { %v528_v33 = vadd.f32 %v496_v38, %v427_v5  ;;  %v1591_v58 = vadd.f32 %v1559_v36, %v1490_v16  ;;  %1261 = vst [vmem:[#allocation2 + $0x28] sm:$0xff] %v3236_v51  ;;  %v1117_v47 = vpop.f32.mrb[5].mxu0  ;;  %v1863_v48 = vmul.f32 %v5279_v18, %v5731_v56  ;;  %v901_v59 = vmul.f32 %v5345_v23, %v2769_v3  ;;  %p3394_p0 = scmp.ne.s32.totalorder %s2560_s7, %s3393_s8  ;;  %p3399_p2 = scmp.lt.s32.totalorder %s3393_s8, %s3393_s8 }
 0x114   :  { %3273 = vmatprep.mubr.msk.f32.mxu0 %vm934_vm0, %v932_v2  ;;  %v2097_v43 = vadd.f32 %v2065_v26, %v1996_v17  ;;  %1260 = vst [vmem:[#allocation2 + $0x20] sm:$0xff] %v1117_v47  ;;  %v1965_v11 = vmul.f32 %v5312_v55, %v3032_v34  ;;  %v2066_v29 = vmul.f32 %v5338_v37, %v3065_v50 }
 0x115   :  { %v629_v15 = vadd.f32 %v597_v35, %v528_v33  ;;  %v1693_v44 = vadd.f32 %v1661_v7, %v1591_v58  ;;  %v2167_v62 = vmul.f32 %v5345_v23, %v3098_v0  ;;  %p3400_p3 = por %p3399_p2, %p3398_p1 }
 0x116   :  { %v2198_v20 = vadd.f32 %v2166_v39, %v2097_v43 }
 0x117   :  { %v731_v60 = vadd.f32 %v699_v1, %v629_v15  ;;  %v1794_v24 = vadd.f32 %v1762_v41, %v1693_v44  ;;  %v3300_v9 = vpop.f32.mrb[4].mxu1  ;;  %p3401_p4 = pnand %p3400_p3, %p3394_p0 }
 0x118   :  { %3337 = vmatprep.mubr.msk.f32.mxu1 %vm934_vm0, %v2198_v20  ;;  %2527 = vst [vmem:[#allocation2 + $0x128] sm:$0xff] %v3300_v9  ;;  %v2382_v18 = vpop.f32.mrb[5].mxu1 }
 0x119   :  { %v832_v56 = vadd.f32 %v800_v57, %v731_v60  ;;  %v1895_v13 = vadd.f32 %v1863_v48, %v1794_v24  ;;  %2526 = vst [vmem:[#allocation2 + $0x120] sm:$0xff] %v2382_v18 }
 0x11b   :  { %v933_v61 = vadd.f32 %v901_v59, %v832_v56  ;;  %v1997_v31 = vadd.f32 %v1965_v11, %v1895_v13 }
 0x11d   :  { %3274 = vmatmul.mubr.msk.f32.gmra.mrb[30].mxu0 %vm934_vm0, %v933_v61  ;;  %v2098_v55 = vadd.f32 %v2066_v29, %v1997_v31 }
 0x11f   :  { %v2199_v42 = vadd.f32 %v2167_v62, %v2098_v55 }
 0x121   :  { %3338 = vmatmul.mubr.msk.f32.gmra.mrb[30].mxu1 %vm934_vm0, %v2199_v42 }
 0x124   :  { %v3239_v25 = vpop.f32.mrb[6].mxu0 }
 0x125   :  { %1263 = vst [vmem:[#allocation2 + $0x38] sm:$0xff] %v3239_v25  ;;  %v1127_v63 = vpop.f32.mrb[7].mxu0 }
 0x126   :  { %1262 = vst [vmem:[#allocation2 + $0x30] sm:$0xff] %v1127_v63 }
 0x128   :  { %v3303_v53 = vpop.f32.mrb[6].mxu1 }
 0x129   :  { %2529 = vst [vmem:[#allocation2 + $0x138] sm:$0xff] %v3303_v53  ;;  %v2392_v8 = vpop.f32.mrb[7].mxu1 }
 0x12a   :  { %2528 = vst [vmem:[#allocation2 + $0x130] sm:$0xff] %v2392_v8 }
 0x135   :  { %v3242_v37 = vpop.f32.mrb[8].mxu0 }
 0x136   :  { %1265 = vst [vmem:[#allocation2 + $0x48] sm:$0xff] %v3242_v37  ;;  %v1137_v27 = vpop.f32.mrb[9].mxu0 }
 0x137   :  { %1264 = vst [vmem:[#allocation2 + $0x40] sm:$0xff] %v1137_v27 }
 0x139   :  { %v3306_v22 = vpop.f32.mrb[8].mxu1 }
 0x13a   :  { %2531 = vst [vmem:[#allocation2 + $0x148] sm:$0xff] %v3306_v22  ;;  %v2402_v23 = vpop.f32.mrb[9].mxu1 }
 0x13b   :  { %2530 = vst [vmem:[#allocation2 + $0x140] sm:$0xff] %v2402_v23 }
 0x146   :  { %v3245_v49 = vpop.f32.mrb[10].mxu0 }
 0x147   :  { %1267 = vst [vmem:[#allocation2 + $0x58] sm:$0xff] %v3245_v49  ;;  %v1147_v30 = vpop.f32.mrb[11].mxu0 }
 0x148   :  { %1266 = vst [vmem:[#allocation2 + $0x50] sm:$0xff] %v1147_v30 }
 0x14a   :  { %v3309_v28 = vpop.f32.mrb[10].mxu1 }
 0x14b   :  { %2533 = vst [vmem:[#allocation2 + $0x158] sm:$0xff] %v3309_v28  ;;  %v2412_v14 = vpop.f32.mrb[11].mxu1 }
 0x14c   :  { %2532 = vst [vmem:[#allocation2 + $0x150] sm:$0xff] %v2412_v14 }
 0x157   :  { %v3248_v21 = vpop.f32.mrb[12].mxu0 }
 0x158   :  { %1269 = vst [vmem:[#allocation2 + $0x68] sm:$0xff] %v3248_v21  ;;  %v1157_v19 = vpop.f32.mrb[13].mxu0 }
 0x159   :  { %1268 = vst [vmem:[#allocation2 + $0x60] sm:$0xff] %v1157_v19 }
 0x15b   :  { %v3312_v10 = vpop.f32.mrb[12].mxu1 }
 0x15c   :  { %2535 = vst [vmem:[#allocation2 + $0x168] sm:$0xff] %v3312_v10  ;;  %v2422_v6 = vpop.f32.mrb[13].mxu1 }
 0x15d   :  { %2534 = vst [vmem:[#allocation2 + $0x160] sm:$0xff] %v2422_v6 }
 0x168   :  { %v3251_v54 = vpop.f32.mrb[14].mxu0 }
 0x169   :  { %1271 = vst [vmem:[#allocation2 + $0x78] sm:$0xff] %v3251_v54  ;;  %v1167_v40 = vpop.f32.mrb[15].mxu0 }
 0x16a   :  { %1270 = vst [vmem:[#allocation2 + $0x70] sm:$0xff] %v1167_v40 }
 0x16c   :  { %v3315_v4 = vpop.f32.mrb[14].mxu1 }
 0x16d   :  { %2537 = vst [vmem:[#allocation2 + $0x178] sm:$0xff] %v3315_v4  ;;  %v2432_v38 = vpop.f32.mrb[15].mxu1 }
 0x16e   :  { %2536 = vst [vmem:[#allocation2 + $0x170] sm:$0xff] %v2432_v38 }
 0x179   :  { %v3254_v52 = vpop.f32.mrb[16].mxu0 }
 0x17a   :  { %1273 = vst [vmem:[#allocation2 + $0x88] sm:$0xff] %v3254_v52  ;;  %v1177_v36 = vpop.f32.mrb[17].mxu0 }
 0x17b   :  { %1272 = vst [vmem:[#allocation2 + $0x80] sm:$0xff] %v1177_v36 }
 0x17d   :  { %v3318_v32 = vpop.f32.mrb[16].mxu1 }
 0x17e   :  { %2539 = vst [vmem:[#allocation2 + $0x188] sm:$0xff] %v3318_v32  ;;  %v2442_v45 = vpop.f32.mrb[17].mxu1 }
 0x17f   :  { %2538 = vst [vmem:[#allocation2 + $0x180] sm:$0xff] %v2442_v45 }
 0x18a   :  { %v3257_v26 = vpop.f32.mrb[18].mxu0 }
 0x18b   :  { %1275 = vst [vmem:[#allocation2 + $0x98] sm:$0xff] %v3257_v26  ;;  %v1187_v12 = vpop.f32.mrb[19].mxu0 }
 0x18c   :  { %1274 = vst [vmem:[#allocation2 + $0x90] sm:$0xff] %v1187_v12 }
 0x18e   :  { %v3321_v5 = vpop.f32.mrb[18].mxu1 }
 0x18f   :  { %2541 = vst [vmem:[#allocation2 + $0x198] sm:$0xff] %v3321_v5  ;;  %v2452_v35 = vpop.f32.mrb[19].mxu1 }
 0x190   :  { %2540 = vst [vmem:[#allocation2 + $0x190] sm:$0xff] %v2452_v35 }
 0x19b   :  { %v3260_v16 = vpop.f32.mrb[20].mxu0 }
 0x19c   :  { %1277 = vst [vmem:[#allocation2 + $0xa8] sm:$0xff] %v3260_v16  ;;  %v1197_v7 = vpop.f32.mrb[21].mxu0 }
 0x19d   :  { %1276 = vst [vmem:[#allocation2 + $0xa0] sm:$0xff] %v1197_v7 }
 0x19f   :  { %v3324_v2 = vpop.f32.mrb[20].mxu1 }
 0x1a0   :  { %2543 = vst [vmem:[#allocation2 + $0x1a8] sm:$0xff] %v3324_v2  ;;  %v2462_v17 = vpop.f32.mrb[21].mxu1 }
 0x1a1   :  { %2542 = vst [vmem:[#allocation2 + $0x1a0] sm:$0xff] %v2462_v17 }
 0x1ac   :  { %v3263_v39 = vpop.f32.mrb[22].mxu0 }
 0x1ad   :  { %1279 = vst [vmem:[#allocation2 + $0xb8] sm:$0xff] %v3263_v39  ;;  %v1207_v46 = vpop.f32.mrb[23].mxu0 }
 0x1ae   :  { %1278 = vst [vmem:[#allocation2 + $0xb0] sm:$0xff] %v1207_v46 }
 0x1b0   :  { %v3327_v51 = vpop.f32.mrb[22].mxu1 }
 0x1b1   :  { %2545 = vst [vmem:[#allocation2 + $0x1b8] sm:$0xff] %v3327_v51  ;;  %v2472_v33 = vpop.f32.mrb[23].mxu1 }
 0x1b2   :  { %2544 = vst [vmem:[#allocation2 + $0x1b0] sm:$0xff] %v2472_v33 }
 0x1bd   :  { %v3266_v1 = vpop.f32.mrb[24].mxu0 }
 0x1be   :  { %1281 = vst [vmem:[#allocation2 + $0xc8] sm:$0xff] %v3266_v1  ;;  %v1217_v58 = vpop.f32.mrb[25].mxu0 }
 0x1bf   :  { %1280 = vst [vmem:[#allocation2 + $0xc0] sm:$0xff] %v1217_v58 }
 0x1c1   :  { %v3330_v41 = vpop.f32.mrb[24].mxu1 }
 0x1c2   :  { %2547 = vst [vmem:[#allocation2 + $0x1c8] sm:$0xff] %v3330_v41  ;;  %v2482_v47 = vpop.f32.mrb[25].mxu1 }
 0x1c3   :  { %2546 = vst [vmem:[#allocation2 + $0x1c0] sm:$0xff] %v2482_v47 }
 0x1ce   :  { %v3269_v43 = vpop.f32.mrb[26].mxu0 }
 0x1cf   :  { %1283 = vst [vmem:[#allocation2 + $0xd8] sm:$0xff] %v3269_v43  ;;  %v1227_v3 = vpop.f32.mrb[27].mxu0 }
 0x1d0   :  { %1282 = vst [vmem:[#allocation2 + $0xd0] sm:$0xff] %v1227_v3 }
 0x1d2   :  { %v3333_v34 = vpop.f32.mrb[26].mxu1 }
 0x1d3   :  { %2549 = vst [vmem:[#allocation2 + $0x1d8] sm:$0xff] %v3333_v34  ;;  %v2492_v15 = vpop.f32.mrb[27].mxu1 }
 0x1d4   :  { %2548 = vst [vmem:[#allocation2 + $0x1d0] sm:$0xff] %v2492_v15 }
 0x1df   :  { %v3272_v57 = vpop.f32.mrb[28].mxu0 }
 0x1e0   :  { %1285 = vst [vmem:[#allocation2 + $0xe8] sm:$0xff] %v3272_v57  ;;  %v1237_v44 = vpop.f32.mrb[29].mxu0 }
 0x1e1   :  { %1284 = vst [vmem:[#allocation2 + $0xe0] sm:$0xff] %v1237_v44 }
 0x1e3   :  { %v3336_v48 = vpop.f32.mrb[28].mxu1 }
 0x1e4   :  { %2551 = vst [vmem:[#allocation2 + $0x1e8] sm:$0xff] %v3336_v48  ;;  %v2502_v20 = vpop.f32.mrb[29].mxu1 }
 0x1e5   :  { %2550 = vst [vmem:[#allocation2 + $0x1e0] sm:$0xff] %v2502_v20 }
 0x1f0   :  { %v3275_v50 = vpop.f32.mrb[30].mxu0 }
 0x1f1   :  { %1287 = vst [vmem:[#allocation2 + $0xf8] sm:$0xff] %v3275_v50  ;;  %v1247_v60 = vpop.f32.mrb[31].mxu0 }
 0x1f2   :  { %1286 = vst [vmem:[#allocation2 + $0xf0] sm:$0xff] %v1247_v60 }
 0x1f4   :  { %v3339_v59 = vpop.f32.mrb[30].mxu1 }
 0x1f5   :  { %2553 = vst [vmem:[#allocation2 + $0x1f8] sm:$0xff] %v3339_v59  ;;  %v2512_v24 = vpop.f32.mrb[31].mxu1 }
 0x1f6   :  { %2552 = vst [vmem:[#allocation2 + $0x1f0] sm:$0xff] %v2512_v24 }
 0x1f7   :  { %3404 = shalt.err (!%p3401_p4)
}
 0x1f8   :  { %s3405_s10 = scalar_lea.hbm %s5829_s3, 8192 }
 0x1f9   :  { %p3406_p5 = scmp.ne.s32.totalorder %s5829_s3, %s3405_s10  ;;  %p3409_p6 = scmp.lt.u32.totalorder %s3405_s10, %s5829_s3 }
 0x1fb   :  { %p3411_p7 = pnand %p3409_p6, %p3406_p5 }
 0x1fd   :  { %3414 = shalt.err (!%p3411_p7)
}
 0x1fe   :  { %s3418_s15 = smov 128   ;;  %s3419_s16 = smov 8  }
 0x1ff   :  { %2565 = dma.vmem_to_hbm [thread:$0]  %s2560_s7, 8192, %s5829_s3, [#allocation3], %s3418_s15, %s3418_s15, %s3419_s16  }
 0x200   :  { %3415 = dma.done.wait [#allocation3], 8192  }
 0x201   :  { %3416 = vsyncadd [#allocation3], 4294959104 }
 0x202   :  { %2569 = vsyncpa [#allocation3], 1 }

</bundles_post_ra>
